<compile_context>
chip_gen: v7x
topology: tpu7x:2x2x1
jax: 0.10.0
libtpu: 0.0.40
codegen_flags: <defaults>
</compile_context>

<pallas_src>
import functools

import jax
import jax.numpy as jnp
from jax.experimental import pallas as pl
from jax.experimental.pallas import tpu as pltpu


def _ssim_kernel(x_ref, y_ref, dr_ref, out_ref, *, win, k1, k2, oh, ow):
    x = x_ref[...].astype(jnp.float32)        # (Nb, H, W)
    y = y_ref[...].astype(jnp.float32)        # (Nb, H, W)
    dr = dr_ref[...].astype(jnp.float32)      # (Nb, 1, 1) per-image data_range

    c1 = (jnp.float32(k1) * dr) ** 2          # broadcasts over (Nb, oh, ow)
    c2 = (jnp.float32(k2) * dr) ** 2

    np_win = win * win
    inv_np = jnp.float32(1.0 / np_win)
    cov_norm = jnp.float32(np_win / (np_win - 1))

    nb, H, _ = x.shape

    # ---- Pass 1: horizontal (lane-axis) running sums, fused over the five
    # moments.  Only 2*win lane-offset slices total; products are formed on
    # the already-sliced (Nb, H, ow) tiles.
    hx = jnp.zeros((nb, H, ow), jnp.float32)
    hy = jnp.zeros((nb, H, ow), jnp.float32)
    hxx = jnp.zeros((nb, H, ow), jnp.float32)
    hyy = jnp.zeros((nb, H, ow), jnp.float32)
    hxy = jnp.zeros((nb, H, ow), jnp.float32)
    for dx in range(win):
        xs = x[:, :, dx:dx + ow]
        ys = y[:, :, dx:dx + ow]
        hx = hx + xs
        hy = hy + ys
        hxx = hxx + xs * xs
        hyy = hyy + ys * ys
        hxy = hxy + ys * xs

    # ---- Pass 2: vertical (sublane-axis) running sums -> 7x7 box outputs.
    ux = jnp.zeros((nb, oh, ow), jnp.float32)
    uy = jnp.zeros((nb, oh, ow), jnp.float32)
    uxx = jnp.zeros((nb, oh, ow), jnp.float32)
    uyy = jnp.zeros((nb, oh, ow), jnp.float32)
    uxy = jnp.zeros((nb, oh, ow), jnp.float32)
    for dy in range(win):
        ux = ux + hx[:, dy:dy + oh, :]
        uy = uy + hy[:, dy:dy + oh, :]
        uxx = uxx + hxx[:, dy:dy + oh, :]
        uyy = uyy + hyy[:, dy:dy + oh, :]
        uxy = uxy + hxy[:, dy:dy + oh, :]

    ux = ux * inv_np
    uy = uy * inv_np
    uxx = uxx * inv_np
    uyy = uyy * inv_np
    uxy = uxy * inv_np

    vx = cov_norm * (uxx - ux * ux)
    vy = cov_norm * (uyy - uy * uy)
    vxy = cov_norm * (uxy - ux * uy)

    a1 = 2.0 * ux * uy + c1
    a2 = 2.0 * vxy + c2
    b1 = ux * ux + uy * uy + c1
    b2 = vx + vy + c2
    s = (a1 * a2) / (b1 * b2)
    # TODO(synk): (a1*a2) * pl.reciprocal(b1*b2, approx=True) would move the
    # divide onto the idle EUP but perturbs low mantissa bits; kept exact.

    # One cross-lane reduce per block; replicate the scalar into a lane-dense
    # (1, 8, 128) output block (unmasked store), finalized in the wrapper.
    partial = jnp.sum(s)
    out_ref[...] = jnp.zeros(out_ref.shape, jnp.float32) + partial


def _pick_batch_block(n, h, w, itemsize):
    """Largest divisor of n whose per-step working set stays well inside VMEM."""
    # double-buffered inputs + f32 casts + 5 horizontal sums + ~8 (oh,ow) temps
    per_image = h * w * (4 * itemsize + 15 * 4)
    budget = 20 * 1024 * 1024
    nb = max(1, min(n, budget // max(per_image, 1)))
    while n % nb:
        nb -= 1
    return nb


def ssim_loss(X, Y, data_range, win_size=7, k1=0.01, k2=0.03):
    """Pallas equivalent of SSIMLoss.forward. X, Y: [N, 1, H, W]; data_range: [N]."""
    N, C, H, W = X.shape
    assert C == 1, "SSIMLoss uses a [1,1,win,win] window -> single-channel input"
    oh = H - win_size + 1
    ow = W - win_size + 1
    assert oh >= 1 and ow >= 1

    x = X[:, 0]                                   # native dtype (no f32 copy here)
    y = Y[:, 0]
    dr = data_range.astype(jnp.float32).reshape(N, 1, 1)

    nb = _pick_batch_block(N, H, W, x.dtype.itemsize)
    num_blocks = N // nb
    # TODO(synk): for single images too large for VMEM, tile H into row blocks
    # with a (win_size-1)-row halo instead of whole-image blocks.

    kernel = functools.partial(
        _ssim_kernel, win=win_size, k1=k1, k2=k2, oh=oh, ow=ow)

    partials = pl.pallas_call(
        kernel,
        out_shape=jax.ShapeDtypeStruct((num_blocks, 8, 128), jnp.float32),
        grid=(num_blocks,),
        in_specs=[
            pl.BlockSpec((nb, H, W), lambda b: (b, 0, 0)),
            pl.BlockSpec((nb, H, W), lambda b: (b, 0, 0)),
            pl.BlockSpec((nb, 1, 1), lambda b: (b, 0, 0)),
        ],
        out_specs=pl.BlockSpec((1, 8, 128), lambda b: (b, 0, 0)),
        compiler_params=pltpu.CompilerParams(
            dimension_semantics=("parallel",),    # no carried state across blocks
            vmem_limit_bytes=32 * 1024 * 1024),
    )(x, y, dr)

    total = jnp.sum(partials[:, 0, 0])
    return 1.0 - total / jnp.float32(N * oh * ow)


def _ssim_loss_ref(X, Y, data_range, win_size=7, k1=0.01, k2=0.03):
    """Pure-JAX reference mirroring the PyTorch module."""
    N, C, H, W = X.shape
    oh, ow = H - win_size + 1, W - win_size + 1
    np_win = win_size * win_size
    cov_norm = np_win / (np_win - 1)

    def box(img):  # img: (N, H, W)
        acc = jnp.zeros((N, oh, ow), jnp.float32)
        for dy in range(win_size):
            for dx in range(win_size):
                acc = acc + img[:, dy:dy + oh, dx:dx + ow]
        return acc / np_win

    x = X[:, 0].astype(jnp.float32)
    y = Y[:, 0].astype(jnp.float32)
    dr = data_range.astype(jnp.float32)[:, None, None]
    c1 = (k1 * dr) ** 2
    c2 = (k2 * dr) ** 2
    ux, uy = box(x), box(y)
    uxx, uyy, uxy = box(x * x), box(y * y), box(x * y)
    vx = cov_norm * (uxx - ux * ux)
    vy = cov_norm * (uyy - uy * uy)
    vxy = cov_norm * (uxy - ux * uy)
    a1, a2 = 2 * ux * uy + c1, 2 * vxy + c2
    b1, b2 = ux * ux + uy * uy + c1, vx + vy + c2
    s = a1 * a2 / (b1 * b2)
    return 1.0 - jnp.mean(s)


if __name__ == "__main__":
    key = jax.random.PRNGKey(0)
    kx, ky = jax.random.split(key)

    N, C, H, W = 2, 1, 16, 16
    X = jax.random.normal(kx, (N, C, H, W), dtype=jnp.float32)
    Y = X + 0.1 * jax.random.normal(ky, (N, C, H, W), dtype=jnp.float32)
    # data_range per batch element (max - min over the target image)
    data_range = (Y.reshape(N, -1).max(axis=1) - Y.reshape(N, -1).min(axis=1))

    loss = ssim_loss(X, Y, data_range)
    loss = jax.block_until_ready(loss)

    ref = _ssim_loss_ref(X, Y, data_range)
    assert jnp.allclose(loss, ref, rtol=1e-3, atol=1e-5), (loss, ref)

    print("KERNEL_OK")
</pallas_src>

<mosaic_0001>
module attributes {stable_mosaic.version = 11 : i64} {
  func.func @_ssim_kernel(%arg0: i32, %arg1: memref<2x16x16xf32, #tpu.memory_space<vmem>>, %arg2: memref<2x16x16xf32, #tpu.memory_space<vmem>>, %arg3: memref<2x1x1xf32, #tpu.memory_space<vmem>>, %arg4: memref<1x8x128xf32, #tpu.memory_space<vmem>>) attributes {dimension_semantics = [#tpu.dimension_semantics<parallel>], iteration_bounds = array<i64: 1>, scalar_prefetch = 0 : i64, scratch_operands = 0 : i64, tpu.core_type = #tpu.core_type<tc>, window_params = [{transform_indices = @transform_0, window_bounds = array<i64: 2, 16, 16>}, {transform_indices = @transform_1, window_bounds = array<i64: 2, 16, 16>}, {transform_indices = @transform_2, window_bounds = array<i64: 2, 1, 1>}, {transform_indices = @transform_3, window_bounds = array<i64: 1, 8, 128>}]} {
    %c0 = arith.constant 0 : index
    %c0_0 = arith.constant 0 : index
    %c0_1 = arith.constant 0 : index
    %0 = vector.load %arg1[%c0, %c0_0, %c0_1] : memref<2x16x16xf32, #tpu.memory_space<vmem>>, vector<2x16x16xf32>
    %c0_2 = arith.constant 0 : index
    %c0_3 = arith.constant 0 : index
    %c0_4 = arith.constant 0 : index
    %1 = vector.load %arg2[%c0_2, %c0_3, %c0_4] : memref<2x16x16xf32, #tpu.memory_space<vmem>>, vector<2x16x16xf32>
    %c0_5 = arith.constant 0 : index
    %c0_6 = arith.constant 0 : index
    %c0_7 = arith.constant 0 : index
    %2 = vector.load %arg3[%c0_5, %c0_6, %c0_7] : memref<2x1x1xf32, #tpu.memory_space<vmem>>, vector<2x1x1xf32>
    %cst = arith.constant 0.00999999977 : f32
    %3 = vector.broadcast %cst : f32 to vector<2x1x1xf32>
    %4 = arith.mulf %3, %2 : vector<2x1x1xf32>
    %5 = arith.mulf %4, %4 : vector<2x1x1xf32>
    %cst_8 = arith.constant 3.000000e-02 : f32
    %6 = vector.broadcast %cst_8 : f32 to vector<2x1x1xf32>
    %7 = arith.mulf %6, %2 : vector<2x1x1xf32>
    %8 = arith.mulf %7, %7 : vector<2x1x1xf32>
    %cst_9 = arith.constant 0.000000e+00 : f32
    %9 = vector.broadcast %cst_9 : f32 to vector<2x16x10xf32>
    %cst_10 = arith.constant 0.000000e+00 : f32
    %10 = vector.broadcast %cst_10 : f32 to vector<2x16x10xf32>
    %cst_11 = arith.constant 0.000000e+00 : f32
    %11 = vector.broadcast %cst_11 : f32 to vector<2x16x10xf32>
    %cst_12 = arith.constant 0.000000e+00 : f32
    %12 = vector.broadcast %cst_12 : f32 to vector<2x16x10xf32>
    %cst_13 = arith.constant 0.000000e+00 : f32
    %13 = vector.broadcast %cst_13 : f32 to vector<2x16x10xf32>
    %14 = vector.extract_strided_slice %0 {offsets = [0, 0, 0], sizes = [2, 16, 10], strides = [1, 1, 1]} : vector<2x16x16xf32> to vector<2x16x10xf32>
    %15 = vector.extract_strided_slice %1 {offsets = [0, 0, 0], sizes = [2, 16, 10], strides = [1, 1, 1]} : vector<2x16x16xf32> to vector<2x16x10xf32>
    %16 = arith.addf %9, %14 : vector<2x16x10xf32>
    %17 = arith.addf %10, %15 : vector<2x16x10xf32>
    %18 = arith.mulf %14, %14 : vector<2x16x10xf32>
    %19 = arith.addf %11, %18 : vector<2x16x10xf32>
    %20 = arith.mulf %15, %15 : vector<2x16x10xf32>
    %21 = arith.addf %12, %20 : vector<2x16x10xf32>
    %22 = arith.mulf %15, %14 : vector<2x16x10xf32>
    %23 = arith.addf %13, %22 : vector<2x16x10xf32>
    %24 = vector.extract_strided_slice %0 {offsets = [0, 0, 1], sizes = [2, 16, 10], strides = [1, 1, 1]} : vector<2x16x16xf32> to vector<2x16x10xf32>
    %25 = vector.extract_strided_slice %1 {offsets = [0, 0, 1], sizes = [2, 16, 10], strides = [1, 1, 1]} : vector<2x16x16xf32> to vector<2x16x10xf32>
    %26 = arith.addf %16, %24 : vector<2x16x10xf32>
    %27 = arith.addf %17, %25 : vector<2x16x10xf32>
    %28 = arith.mulf %24, %24 : vector<2x16x10xf32>
    %29 = arith.addf %19, %28 : vector<2x16x10xf32>
    %30 = arith.mulf %25, %25 : vector<2x16x10xf32>
    %31 = arith.addf %21, %30 : vector<2x16x10xf32>
    %32 = arith.mulf %25, %24 : vector<2x16x10xf32>
    %33 = arith.addf %23, %32 : vector<2x16x10xf32>
    %34 = vector.extract_strided_slice %0 {offsets = [0, 0, 2], sizes = [2, 16, 10], strides = [1, 1, 1]} : vector<2x16x16xf32> to vector<2x16x10xf32>
    %35 = vector.extract_strided_slice %1 {offsets = [0, 0, 2], sizes = [2, 16, 10], strides = [1, 1, 1]} : vector<2x16x16xf32> to vector<2x16x10xf32>
    %36 = arith.addf %26, %34 : vector<2x16x10xf32>
    %37 = arith.addf %27, %35 : vector<2x16x10xf32>
    %38 = arith.mulf %34, %34 : vector<2x16x10xf32>
    %39 = arith.addf %29, %38 : vector<2x16x10xf32>
    %40 = arith.mulf %35, %35 : vector<2x16x10xf32>
    %41 = arith.addf %31, %40 : vector<2x16x10xf32>
    %42 = arith.mulf %35, %34 : vector<2x16x10xf32>
    %43 = arith.addf %33, %42 : vector<2x16x10xf32>
    %44 = vector.extract_strided_slice %0 {offsets = [0, 0, 3], sizes = [2, 16, 10], strides = [1, 1, 1]} : vector<2x16x16xf32> to vector<2x16x10xf32>
    %45 = vector.extract_strided_slice %1 {offsets = [0, 0, 3], sizes = [2, 16, 10], strides = [1, 1, 1]} : vector<2x16x16xf32> to vector<2x16x10xf32>
    %46 = arith.addf %36, %44 : vector<2x16x10xf32>
    %47 = arith.addf %37, %45 : vector<2x16x10xf32>
    %48 = arith.mulf %44, %44 : vector<2x16x10xf32>
    %49 = arith.addf %39, %48 : vector<2x16x10xf32>
    %50 = arith.mulf %45, %45 : vector<2x16x10xf32>
    %51 = arith.addf %41, %50 : vector<2x16x10xf32>
    %52 = arith.mulf %45, %44 : vector<2x16x10xf32>
    %53 = arith.addf %43, %52 : vector<2x16x10xf32>
    %54 = vector.extract_strided_slice %0 {offsets = [0, 0, 4], sizes = [2, 16, 10], strides = [1, 1, 1]} : vector<2x16x16xf32> to vector<2x16x10xf32>
    %55 = vector.extract_strided_slice %1 {offsets = [0, 0, 4], sizes = [2, 16, 10], strides = [1, 1, 1]} : vector<2x16x16xf32> to vector<2x16x10xf32>
    %56 = arith.addf %46, %54 : vector<2x16x10xf32>
    %57 = arith.addf %47, %55 : vector<2x16x10xf32>
    %58 = arith.mulf %54, %54 : vector<2x16x10xf32>
    %59 = arith.addf %49, %58 : vector<2x16x10xf32>
    %60 = arith.mulf %55, %55 : vector<2x16x10xf32>
    %61 = arith.addf %51, %60 : vector<2x16x10xf32>
    %62 = arith.mulf %55, %54 : vector<2x16x10xf32>
    %63 = arith.addf %53, %62 : vector<2x16x10xf32>
    %64 = vector.extract_strided_slice %0 {offsets = [0, 0, 5], sizes = [2, 16, 10], strides = [1, 1, 1]} : vector<2x16x16xf32> to vector<2x16x10xf32>
    %65 = vector.extract_strided_slice %1 {offsets = [0, 0, 5], sizes = [2, 16, 10], strides = [1, 1, 1]} : vector<2x16x16xf32> to vector<2x16x10xf32>
    %66 = arith.addf %56, %64 : vector<2x16x10xf32>
    %67 = arith.addf %57, %65 : vector<2x16x10xf32>
    %68 = arith.mulf %64, %64 : vector<2x16x10xf32>
    %69 = arith.addf %59, %68 : vector<2x16x10xf32>
    %70 = arith.mulf %65, %65 : vector<2x16x10xf32>
    %71 = arith.addf %61, %70 : vector<2x16x10xf32>
    %72 = arith.mulf %65, %64 : vector<2x16x10xf32>
    %73 = arith.addf %63, %72 : vector<2x16x10xf32>
    %74 = vector.extract_strided_slice %0 {offsets = [0, 0, 6], sizes = [2, 16, 10], strides = [1, 1, 1]} : vector<2x16x16xf32> to vector<2x16x10xf32>
    %75 = vector.extract_strided_slice %1 {offsets = [0, 0, 6], sizes = [2, 16, 10], strides = [1, 1, 1]} : vector<2x16x16xf32> to vector<2x16x10xf32>
    %76 = arith.addf %66, %74 : vector<2x16x10xf32>
    %77 = arith.addf %67, %75 : vector<2x16x10xf32>
    %78 = arith.mulf %74, %74 : vector<2x16x10xf32>
    %79 = arith.addf %69, %78 : vector<2x16x10xf32>
    %80 = arith.mulf %75, %75 : vector<2x16x10xf32>
    %81 = arith.addf %71, %80 : vector<2x16x10xf32>
    %82 = arith.mulf %75, %74 : vector<2x16x10xf32>
    %83 = arith.addf %73, %82 : vector<2x16x10xf32>
    %cst_14 = arith.constant 0.000000e+00 : f32
    %84 = vector.broadcast %cst_14 : f32 to vector<2x10x10xf32>
    %cst_15 = arith.constant 0.000000e+00 : f32
    %85 = vector.broadcast %cst_15 : f32 to vector<2x10x10xf32>
    %cst_16 = arith.constant 0.000000e+00 : f32
    %86 = vector.broadcast %cst_16 : f32 to vector<2x10x10xf32>
    %cst_17 = arith.constant 0.000000e+00 : f32
    %87 = vector.broadcast %cst_17 : f32 to vector<2x10x10xf32>
    %cst_18 = arith.constant 0.000000e+00 : f32
    %88 = vector.broadcast %cst_18 : f32 to vector<2x10x10xf32>
    %89 = vector.extract_strided_slice %76 {offsets = [0, 0, 0], sizes = [2, 10, 10], strides = [1, 1, 1]} : vector<2x16x10xf32> to vector<2x10x10xf32>
    %90 = arith.addf %84, %89 : vector<2x10x10xf32>
    %91 = vector.extract_strided_slice %77 {offsets = [0, 0, 0], sizes = [2, 10, 10], strides = [1, 1, 1]} : vector<2x16x10xf32> to vector<2x10x10xf32>
    %92 = arith.addf %85, %91 : vector<2x10x10xf32>
    %93 = vector.extract_strided_slice %79 {offsets = [0, 0, 0], sizes = [2, 10, 10], strides = [1, 1, 1]} : vector<2x16x10xf32> to vector<2x10x10xf32>
    %94 = arith.addf %86, %93 : vector<2x10x10xf32>
    %95 = vector.extract_strided_slice %81 {offsets = [0, 0, 0], sizes = [2, 10, 10], strides = [1, 1, 1]} : vector<2x16x10xf32> to vector<2x10x10xf32>
    %96 = arith.addf %87, %95 : vector<2x10x10xf32>
    %97 = vector.extract_strided_slice %83 {offsets = [0, 0, 0], sizes = [2, 10, 10], strides = [1, 1, 1]} : vector<2x16x10xf32> to vector<2x10x10xf32>
    %98 = arith.addf %88, %97 : vector<2x10x10xf32>
    %99 = vector.extract_strided_slice %76 {offsets = [0, 1, 0], sizes = [2, 10, 10], strides = [1, 1, 1]} : vector<2x16x10xf32> to vector<2x10x10xf32>
    %100 = arith.addf %90, %99 : vector<2x10x10xf32>
    %101 = vector.extract_strided_slice %77 {offsets = [0, 1, 0], sizes = [2, 10, 10], strides = [1, 1, 1]} : vector<2x16x10xf32> to vector<2x10x10xf32>
    %102 = arith.addf %92, %101 : vector<2x10x10xf32>
    %103 = vector.extract_strided_slice %79 {offsets = [0, 1, 0], sizes = [2, 10, 10], strides = [1, 1, 1]} : vector<2x16x10xf32> to vector<2x10x10xf32>
    %104 = arith.addf %94, %103 : vector<2x10x10xf32>
    %105 = vector.extract_strided_slice %81 {offsets = [0, 1, 0], sizes = [2, 10, 10], strides = [1, 1, 1]} : vector<2x16x10xf32> to vector<2x10x10xf32>
    %106 = arith.addf %96, %105 : vector<2x10x10xf32>
    %107 = vector.extract_strided_slice %83 {offsets = [0, 1, 0], sizes = [2, 10, 10], strides = [1, 1, 1]} : vector<2x16x10xf32> to vector<2x10x10xf32>
    %108 = arith.addf %98, %107 : vector<2x10x10xf32>
    %109 = vector.extract_strided_slice %76 {offsets = [0, 2, 0], sizes = [2, 10, 10], strides = [1, 1, 1]} : vector<2x16x10xf32> to vector<2x10x10xf32>
    %110 = arith.addf %100, %109 : vector<2x10x10xf32>
    %111 = vector.extract_strided_slice %77 {offsets = [0, 2, 0], sizes = [2, 10, 10], strides = [1, 1, 1]} : vector<2x16x10xf32> to vector<2x10x10xf32>
    %112 = arith.addf %102, %111 : vector<2x10x10xf32>
    %113 = vector.extract_strided_slice %79 {offsets = [0, 2, 0], sizes = [2, 10, 10], strides = [1, 1, 1]} : vector<2x16x10xf32> to vector<2x10x10xf32>
    %114 = arith.addf %104, %113 : vector<2x10x10xf32>
    %115 = vector.extract_strided_slice %81 {offsets = [0, 2, 0], sizes = [2, 10, 10], strides = [1, 1, 1]} : vector<2x16x10xf32> to vector<2x10x10xf32>
    %116 = arith.addf %106, %115 : vector<2x10x10xf32>
    %117 = vector.extract_strided_slice %83 {offsets = [0, 2, 0], sizes = [2, 10, 10], strides = [1, 1, 1]} : vector<2x16x10xf32> to vector<2x10x10xf32>
    %118 = arith.addf %108, %117 : vector<2x10x10xf32>
    %119 = vector.extract_strided_slice %76 {offsets = [0, 3, 0], sizes = [2, 10, 10], strides = [1, 1, 1]} : vector<2x16x10xf32> to vector<2x10x10xf32>
    %120 = arith.addf %110, %119 : vector<2x10x10xf32>
    %121 = vector.extract_strided_slice %77 {offsets = [0, 3, 0], sizes = [2, 10, 10], strides = [1, 1, 1]} : vector<2x16x10xf32> to vector<2x10x10xf32>
    %122 = arith.addf %112, %121 : vector<2x10x10xf32>
    %123 = vector.extract_strided_slice %79 {offsets = [0, 3, 0], sizes = [2, 10, 10], strides = [1, 1, 1]} : vector<2x16x10xf32> to vector<2x10x10xf32>
    %124 = arith.addf %114, %123 : vector<2x10x10xf32>
    %125 = vector.extract_strided_slice %81 {offsets = [0, 3, 0], sizes = [2, 10, 10], strides = [1, 1, 1]} : vector<2x16x10xf32> to vector<2x10x10xf32>
    %126 = arith.addf %116, %125 : vector<2x10x10xf32>
    %127 = vector.extract_strided_slice %83 {offsets = [0, 3, 0], sizes = [2, 10, 10], strides = [1, 1, 1]} : vector<2x16x10xf32> to vector<2x10x10xf32>
    %128 = arith.addf %118, %127 : vector<2x10x10xf32>
    %129 = vector.extract_strided_slice %76 {offsets = [0, 4, 0], sizes = [2, 10, 10], strides = [1, 1, 1]} : vector<2x16x10xf32> to vector<2x10x10xf32>
    %130 = arith.addf %120, %129 : vector<2x10x10xf32>
    %131 = vector.extract_strided_slice %77 {offsets = [0, 4, 0], sizes = [2, 10, 10], strides = [1, 1, 1]} : vector<2x16x10xf32> to vector<2x10x10xf32>
    %132 = arith.addf %122, %131 : vector<2x10x10xf32>
    %133 = vector.extract_strided_slice %79 {offsets = [0, 4, 0], sizes = [2, 10, 10], strides = [1, 1, 1]} : vector<2x16x10xf32> to vector<2x10x10xf32>
    %134 = arith.addf %124, %133 : vector<2x10x10xf32>
    %135 = vector.extract_strided_slice %81 {offsets = [0, 4, 0], sizes = [2, 10, 10], strides = [1, 1, 1]} : vector<2x16x10xf32> to vector<2x10x10xf32>
    %136 = arith.addf %126, %135 : vector<2x10x10xf32>
    %137 = vector.extract_strided_slice %83 {offsets = [0, 4, 0], sizes = [2, 10, 10], strides = [1, 1, 1]} : vector<2x16x10xf32> to vector<2x10x10xf32>
    %138 = arith.addf %128, %137 : vector<2x10x10xf32>
    %139 = vector.extract_strided_slice %76 {offsets = [0, 5, 0], sizes = [2, 10, 10], strides = [1, 1, 1]} : vector<2x16x10xf32> to vector<2x10x10xf32>
    %140 = arith.addf %130, %139 : vector<2x10x10xf32>
    %141 = vector.extract_strided_slice %77 {offsets = [0, 5, 0], sizes = [2, 10, 10], strides = [1, 1, 1]} : vector<2x16x10xf32> to vector<2x10x10xf32>
    %142 = arith.addf %132, %141 : vector<2x10x10xf32>
    %143 = vector.extract_strided_slice %79 {offsets = [0, 5, 0], sizes = [2, 10, 10], strides = [1, 1, 1]} : vector<2x16x10xf32> to vector<2x10x10xf32>
    %144 = arith.addf %134, %143 : vector<2x10x10xf32>
    %145 = vector.extract_strided_slice %81 {offsets = [0, 5, 0], sizes = [2, 10, 10], strides = [1, 1, 1]} : vector<2x16x10xf32> to vector<2x10x10xf32>
    %146 = arith.addf %136, %145 : vector<2x10x10xf32>
    %147 = vector.extract_strided_slice %83 {offsets = [0, 5, 0], sizes = [2, 10, 10], strides = [1, 1, 1]} : vector<2x16x10xf32> to vector<2x10x10xf32>
    %148 = arith.addf %138, %147 : vector<2x10x10xf32>
    %149 = vector.extract_strided_slice %76 {offsets = [0, 6, 0], sizes = [2, 10, 10], strides = [1, 1, 1]} : vector<2x16x10xf32> to vector<2x10x10xf32>
    %150 = arith.addf %140, %149 : vector<2x10x10xf32>
    %151 = vector.extract_strided_slice %77 {offsets = [0, 6, 0], sizes = [2, 10, 10], strides = [1, 1, 1]} : vector<2x16x10xf32> to vector<2x10x10xf32>
    %152 = arith.addf %142, %151 : vector<2x10x10xf32>
    %153 = vector.extract_strided_slice %79 {offsets = [0, 6, 0], sizes = [2, 10, 10], strides = [1, 1, 1]} : vector<2x16x10xf32> to vector<2x10x10xf32>
    %154 = arith.addf %144, %153 : vector<2x10x10xf32>
    %155 = vector.extract_strided_slice %81 {offsets = [0, 6, 0], sizes = [2, 10, 10], strides = [1, 1, 1]} : vector<2x16x10xf32> to vector<2x10x10xf32>
    %156 = arith.addf %146, %155 : vector<2x10x10xf32>
    %157 = vector.extract_strided_slice %83 {offsets = [0, 6, 0], sizes = [2, 10, 10], strides = [1, 1, 1]} : vector<2x16x10xf32> to vector<2x10x10xf32>
    %158 = arith.addf %148, %157 : vector<2x10x10xf32>
    %cst_19 = arith.constant 0.0204081628 : f32
    %159 = vector.broadcast %cst_19 : f32 to vector<2x10x10xf32>
    %160 = arith.mulf %150, %159 : vector<2x10x10xf32>
    %cst_20 = arith.constant 0.0204081628 : f32
    %161 = vector.broadcast %cst_20 : f32 to vector<2x10x10xf32>
    %162 = arith.mulf %152, %161 : vector<2x10x10xf32>
    %cst_21 = arith.constant 0.0204081628 : f32
    %163 = vector.broadcast %cst_21 : f32 to vector<2x10x10xf32>
    %164 = arith.mulf %154, %163 : vector<2x10x10xf32>
    %cst_22 = arith.constant 0.0204081628 : f32
    %165 = vector.broadcast %cst_22 : f32 to vector<2x10x10xf32>
    %166 = arith.mulf %156, %165 : vector<2x10x10xf32>
    %cst_23 = arith.constant 0.0204081628 : f32
    %167 = vector.broadcast %cst_23 : f32 to vector<2x10x10xf32>
    %168 = arith.mulf %158, %167 : vector<2x10x10xf32>
    %169 = arith.mulf %160, %160 : vector<2x10x10xf32>
    %170 = arith.subf %164, %169 : vector<2x10x10xf32>
    %cst_24 = arith.constant 1.02083337 : f32
    %171 = vector.broadcast %cst_24 : f32 to vector<2x10x10xf32>
    %172 = arith.mulf %171, %170 : vector<2x10x10xf32>
    %173 = arith.mulf %162, %162 : vector<2x10x10xf32>
    %174 = arith.subf %166, %173 : vector<2x10x10xf32>
    %cst_25 = arith.constant 1.02083337 : f32
    %175 = vector.broadcast %cst_25 : f32 to vector<2x10x10xf32>
    %176 = arith.mulf %175, %174 : vector<2x10x10xf32>
    %177 = arith.mulf %160, %162 : vector<2x10x10xf32>
    %178 = arith.subf %168, %177 : vector<2x10x10xf32>
    %cst_26 = arith.constant 1.02083337 : f32
    %179 = vector.broadcast %cst_26 : f32 to vector<2x10x10xf32>
    %180 = arith.mulf %179, %178 : vector<2x10x10xf32>
    %cst_27 = arith.constant 2.000000e+00 : f32
    %181 = vector.broadcast %cst_27 : f32 to vector<2x10x10xf32>
    %182 = arith.mulf %181, %160 : vector<2x10x10xf32>
    %183 = arith.mulf %182, %162 : vector<2x10x10xf32>
    %184 = vector.broadcast %5 : vector<2x1x1xf32> to vector<2x10x10xf32>
    %185 = arith.addf %183, %184 : vector<2x10x10xf32>
    %cst_28 = arith.constant 2.000000e+00 : f32
    %186 = vector.broadcast %cst_28 : f32 to vector<2x10x10xf32>
    %187 = arith.mulf %186, %180 : vector<2x10x10xf32>
    %188 = vector.broadcast %8 : vector<2x1x1xf32> to vector<2x10x10xf32>
    %189 = arith.addf %187, %188 : vector<2x10x10xf32>
    %190 = arith.mulf %160, %160 : vector<2x10x10xf32>
    %191 = arith.mulf %162, %162 : vector<2x10x10xf32>
    %192 = arith.addf %190, %191 : vector<2x10x10xf32>
    %193 = vector.broadcast %5 : vector<2x1x1xf32> to vector<2x10x10xf32>
    %194 = arith.addf %192, %193 : vector<2x10x10xf32>
    %195 = arith.addf %172, %176 : vector<2x10x10xf32>
    %196 = vector.broadcast %8 : vector<2x1x1xf32> to vector<2x10x10xf32>
    %197 = arith.addf %195, %196 : vector<2x10x10xf32>
    %198 = arith.mulf %185, %189 : vector<2x10x10xf32>
    %199 = arith.mulf %194, %197 : vector<2x10x10xf32>
    %200 = arith.divf %198, %199 : vector<2x10x10xf32>
    %201 = vector.shape_cast %200 : vector<2x10x10xf32> to vector<1x2x10x10xf32>
    %cst_29 = arith.constant dense<0.000000e+00> : vector<1xf32>
    %202 = vector.multi_reduction <add>, %201, %cst_29 [1, 2, 3] : vector<1x2x10x10xf32> to vector<1xf32>
    %203 = vector.shape_cast %202 : vector<1xf32> to vector<1x1x1x1xf32>
    %204 = vector.extract %203[0, 0, 0, 0] : f32 from vector<1x1x1x1xf32>
    %cst_30 = arith.constant 0.000000e+00 : f32
    %205 = vector.broadcast %cst_30 : f32 to vector<1x8x128xf32>
    %206 = vector.broadcast %204 : f32 to vector<1x8x128xf32>
    %207 = arith.addf %205, %206 : vector<1x8x128xf32>
    %c0_31 = arith.constant 0 : index
    %c0_32 = arith.constant 0 : index
    %c0_33 = arith.constant 0 : index
    %208 = vector.load %arg4[%c0_31, %c0_32, %c0_33] : memref<1x8x128xf32, #tpu.memory_space<vmem>>, vector<1x8x128xf32>
    tpu.vector_store %arg4[%c0_31, %c0_32, %c0_33], %207 {strides = array<i32>} : memref<1x8x128xf32, #tpu.memory_space<vmem>>, vector<1x8x128xf32>,
    return
  }
  func.func @transform_0(%arg0: i32) -> (i32, i32, i32) {
    %c0_i32 = arith.constant 0 : i32
    %c0_i32_0 = arith.constant 0 : i32
    %c0_i32_1 = arith.constant 0 : i32
    return %arg0, %c0_i32, %c0_i32_0 : i32, i32, i32
  }
  func.func @transform_1(%arg0: i32) -> (i32, i32, i32) {
    %c0_i32 = arith.constant 0 : i32
    %c0_i32_0 = arith.constant 0 : i32
    %c0_i32_1 = arith.constant 0 : i32
    return %arg0, %c0_i32, %c0_i32_0 : i32, i32, i32
  }
  func.func @transform_2(%arg0: i32) -> (i32, i32, i32) {
    %c0_i32 = arith.constant 0 : i32
    %c0_i32_0 = arith.constant 0 : i32
    %c0_i32_1 = arith.constant 0 : i32
    return %arg0, %c0_i32, %c0_i32_0 : i32, i32, i32
  }
  func.func @transform_3(%arg0: i32) -> (i32, i32, i32) {
    %c0_i32 = arith.constant 0 : i32
    %c0_i32_0 = arith.constant 0 : i32
    %c0_i32_1 = arith.constant 0 : i32
    return %arg0, %c0_i32, %c0_i32_0 : i32, i32, i32
  }
}

</mosaic_0001>

<bundles_post_ra>
// kernel: tpu_custom_call.1
= control target key start
LH: loop header
LB: loop body
LE: loop exit
PB: predicated region body
PF: predicated region fallthrough
CT: control target
= control target key end

     0   :  { %8 = vsyncpa [#allocation3], 0  ;;  %s2307_s0 = inlined_call_operand.hbm [shape: f32[2,16,16], index: 0, kind: input, shape index: {}]   ;;  %s2308_s1 = inlined_call_operand.hbm [shape: f32[2,16,16], index: 1, kind: input, shape index: {}]   ;;  %s2309_s2 = inlined_call_operand.vmem [shape: f32[2,1,1], index: 2, kind: input, shape index: {}]   ;;  %s2310_s3 = inlined_call_operand.hbm [shape: f32[1,8,128], index: 3, kind: output, shape index: {}]  }
   0x1   :  { %9 = vsyncpa [#allocation6], 0 }
   0x2   :  { %10 = vsyncpa [#allocation4], 0  ;;  %s1336_s12 = smov [#allocation2]   ;;  %s1264_s16 = scalar_lea.hbm %s2307_s0, 512 }
   0x3   :  { %s16_s13 = sshll.u32 %s1336_s12, 4  ;;  %p1265_p0 = scmp.ne.s32.totalorder %s2307_s0, %s1264_s16  ;;  %s17_s13 = int_to_ptr.vmem [resolvable:$true] %s16_s13 }
   0x4   :  { %p1268_p1 = scmp.lt.u32.totalorder %s1264_s16, %s2307_s0 }
   0x6   :  { %p1270_p2 = pnand %p1268_p1, %p1265_p0 }
   0x8   :  { %1273 = shalt.err (!%p1270_p2)
}
   0x9   :  { %s1274_s21 = scalar_lea.vmem %s17_s13, 512  ;;  %p1279_p4 = scmp.lt.s32.totalorder %s17_s13, %s17_s13 }
   0xa   :  { %p1275_p3 = scmp.ne.s32.totalorder %s17_s13, %s1274_s21  ;;  %p1280_p5 = scmp.lt.s32.totalorder %s1274_s21, %s1274_s21 }
   0xc   :  { %p1281_p6 = por %p1280_p5, %p1279_p4 }
   0xe   :  { %p1282_p7 = pnand %p1281_p6, %p1275_p3 }
  0x10   :  { %1285 = shalt.err (!%p1282_p7)
}
  0x11   :  { %s1337_s22 = smov 128   ;;  %s1338_s23 = smov 8  }
  0x12   :  { %22 = dma.hbm_to_vmem [thread:$0]  %s2307_s0, 512, %s17_s13, [#allocation3], %s1337_s22, %s1337_s22, %s1338_s23  }
  0x13   :  { %s1339_s26 = smov [#allocation5]   ;;  %s1286_s30 = scalar_lea.hbm %s2308_s1, 512 }
  0x14   :  { %s28_s27 = sshll.u32 %s1339_s26, 4  ;;  %p1287_p8 = scmp.ne.s32.totalorder %s2308_s1, %s1286_s30  ;;  %s29_s27 = int_to_ptr.vmem [resolvable:$true] %s28_s27 }
  0x15   :  { %p1290_p9 = scmp.lt.u32.totalorder %s1286_s30, %s2308_s1 }
  0x17   :  { %p1292_p10 = pnand %p1290_p9, %p1287_p8 }
  0x19   :  { %1295 = shalt.err (!%p1292_p10)
}
  0x1a   :  { %s1296_s8 = scalar_lea.vmem %s29_s27, 512  ;;  %p1301_p12 = scmp.lt.s32.totalorder %s29_s27, %s29_s27 }
  0x1b   :  { %p1297_p11 = scmp.ne.s32.totalorder %s29_s27, %s1296_s8  ;;  %p1302_p13 = scmp.lt.s32.totalorder %s1296_s8, %s1296_s8 }
  0x1d   :  { %p1303_p0 = por %p1302_p13, %p1301_p12 }
  0x1f   :  { %p1304_p1 = pnand %p1303_p0, %p1297_p11 }
  0x21   :  { %1307 = shalt.err (!%p1304_p1)
}
  0x22   :  { %34 = dma.hbm_to_vmem [thread:$0]  %s2308_s1, 512, %s29_s27, [#allocation6], %s1337_s22, %s1337_s22, %s1338_s23  }
  0x23   :  { %1330 = dma.done.wait [#allocation3], 512  }
  0x24   :  { %1331 = vsyncadd [#allocation3], 4294966784 }
  0x25   :  { %1332 = dma.done.wait [#allocation6], 512  }
  0x26   :  { %1333 = vsyncadd [#allocation6], 4294966784  ;;  %v1392_v0 = vld [vmem:[#allocation2 + $0x10] sm:$0xff]  ;;  %v1394_v1 = vld [vmem:[#allocation2] sm:$0xff]  ;;  %s1340_s10 = smov 127   ;;  %s1341_s1 = smov 126  }
  0x27   :  { %101 = vrot.lane.b32.xlu1 %v1392_v0, %s1340_s10  ;;  %97 = vrot.lane.b32.xlu0 %v1394_v1, %s1340_s10  ;;  %v1400_v2 = vld [vmem:[#allocation2 + $0x18] sm:$0xff]  ;;  %v1402_v3 = vld [vmem:[#allocation2 + $0x8] sm:$0xff]  ;;  %v1410_v5 = vld [vmem:[#allocation5] sm:$0xff]  ;;  %v1430_v9 = vmul.f32 %v1394_v1, %v1394_v1  ;;  %v1462_v13 = vmul.f32 %v1392_v0, %v1392_v0  ;;  %s1342_s11 = smov 125   ;;  %s1343_s12 = smov 124   ;;  %v1344_v16 = vmov 0  }
  0x28   :  { %v1408_v4 = vld [vmem:[#allocation5 + $0x8] sm:$0xff]  ;;  %v1416_v6 = vld [vmem:[#allocation5 + $0x18] sm:$0xff]  ;;  %v1418_v7 = vld [vmem:[#allocation5 + $0x10] sm:$0xff]  ;;  %v1426_v8 = vmul.f32 %v1402_v3, %v1402_v3  ;;  %v1442_v11 = vmul.f32 %v1410_v5, %v1410_v5  ;;  %v1458_v12 = vmul.f32 %v1400_v2, %v1400_v2  ;;  %1255 = vset.pattern.permute.xlu1 %v1344_v16  ;;  %1254 = vset.pattern.permute.xlu0 %v1344_v16  ;;  %s1345_s13 = smov 123   ;;  %s1346_s14 = smov 122   ;;  %vm617_vm0 = vcmask 1046528  }
  0x29   :  { %v1438_v10 = vmul.f32 %v1408_v4, %v1408_v4  ;;  %v1470_v14 = vmul.f32 %v1416_v6, %v1416_v6  ;;  %v1474_v15 = vmul.f32 %v1418_v7, %v1418_v7  ;;  %v1680_v51 = vmul.f32 %v1408_v4, %v1402_v3 }
  0x2a   :  { %v1684_v52 = vmul.f32 %v1410_v5, %v1394_v1  ;;  %v1712_v59 = vmul.f32 %v1416_v6, %v1400_v2  ;;  %v1716_v60 = vmul.f32 %v1418_v7, %v1392_v0  ;;  %vm704_vm1 = vcmask 1045504  }
  0x2b   :  { %103 = vrot.lane.b32.xlu1 %v1400_v2, %s1340_s10  ;;  %99 = vrot.lane.b32.xlu0 %v1402_v3, %s1340_s10  ;;  %2312 = vst [vmem:[#allocation11_spill] sm:$0xff] %v1438_v10  ;;  %vm775_vm2 = vcmask 1044480   ;;  %vm846_vm3 = vcmask 1043456   ;;  %vm917_vm4 = vcmask 1042432   ;;  %vm988_vm5 = vcmask 1041408  }
  0x2c   :  { %vm1203_vm6 = vcmask 80896   ;;  %vm1205_vm7 = vcmask 74752  }
  0x2f   :  { %119 = vrot.lane.b32.xlu1 %v1408_v4, %s1340_s10  ;;  %117 = vrot.lane.b32.xlu0 %v1410_v5, %s1340_s10 }
  0x33   :  { %123 = vrot.lane.b32.xlu1 %v1416_v6, %s1340_s10  ;;  %121 = vrot.lane.b32.xlu0 %v1418_v7, %s1340_s10 }
  0x37   :  { %139 = vrot.lane.b32.xlu1 %v1426_v8, %s1340_s10  ;;  %137 = vrot.lane.b32.xlu0 %v1430_v9, %s1340_s10 }
  0x3b   :  { %159 = vrot.lane.b32.xlu1 %v1438_v10, %s1340_s10  ;;  %157 = vrot.lane.b32.xlu0 %v1442_v11, %s1340_s10 }
  0x3f   :  { %195 = vrot.lane.b32.xlu1 %v1402_v3, %s1341_s1  ;;  %193 = vrot.lane.b32.xlu0 %v1394_v1, %s1341_s1 }
  0x43   :  { %211 = vrot.lane.b32.xlu1 %v1408_v4, %s1341_s1  ;;  %209 = vrot.lane.b32.xlu0 %v1410_v5, %s1341_s1 }
  0x47   :  { %143 = vrot.lane.b32.xlu1 %v1458_v12, %s1340_s10  ;;  %141 = vrot.lane.b32.xlu0 %v1462_v13, %s1340_s10 }
  0x4b   :  { %163 = vrot.lane.b32.xlu1 %v1470_v14, %s1340_s10  ;;  %161 = vrot.lane.b32.xlu0 %v1474_v15, %s1340_s10 }
  0x4f   :  { %199 = vrot.lane.b32.xlu1 %v1400_v2, %s1341_s1  ;;  %197 = vrot.lane.b32.xlu0 %v1392_v0, %s1341_s1 }
  0x53   :  { %215 = vrot.lane.b32.xlu1 %v1416_v6, %s1341_s1  ;;  %213 = vrot.lane.b32.xlu0 %v1418_v7, %s1341_s1 }
  0x57   :  { %227 = vrot.lane.b32.xlu1 %v1426_v8, %s1341_s1  ;;  %225 = vrot.lane.b32.xlu0 %v1430_v9, %s1341_s1 }
  0x5b   :  { %243 = vrot.lane.b32.xlu1 %v1438_v10, %s1341_s1  ;;  %241 = vrot.lane.b32.xlu0 %v1442_v11, %s1341_s1 }
  0x5f   :  { %275 = vrot.lane.b32.xlu1 %v1402_v3, %s1342_s11  ;;  %273 = vrot.lane.b32.xlu0 %v1394_v1, %s1342_s11 }
  0x63   :  { %291 = vrot.lane.b32.xlu1 %v1408_v4, %s1342_s11  ;;  %289 = vrot.lane.b32.xlu0 %v1410_v5, %s1342_s11 }
  0x67   :  { %231 = vrot.lane.b32.xlu1 %v1458_v12, %s1341_s1  ;;  %229 = vrot.lane.b32.xlu0 %v1462_v13, %s1341_s1 }
  0x6b   :  { %247 = vrot.lane.b32.xlu1 %v1470_v14, %s1341_s1  ;;  %245 = vrot.lane.b32.xlu0 %v1474_v15, %s1341_s1 }
  0x6f   :  { %279 = vrot.lane.b32.xlu1 %v1400_v2, %s1342_s11  ;;  %277 = vrot.lane.b32.xlu0 %v1392_v0, %s1342_s11 }
  0x73   :  { %295 = vrot.lane.b32.xlu1 %v1416_v6, %s1342_s11  ;;  %293 = vrot.lane.b32.xlu0 %v1418_v7, %s1342_s11 }
  0x77   :  { %307 = vrot.lane.b32.xlu1 %v1426_v8, %s1342_s11  ;;  %305 = vrot.lane.b32.xlu0 %v1430_v9, %s1342_s11 }
  0x7b   :  { %323 = vrot.lane.b32.xlu1 %v1438_v10, %s1342_s11  ;;  %321 = vrot.lane.b32.xlu0 %v1442_v11, %s1342_s11 }
  0x7f   :  { %355 = vrot.lane.b32.xlu1 %v1402_v3, %s1343_s12  ;;  %353 = vrot.lane.b32.xlu0 %v1394_v1, %s1343_s12 }
  0x83   :  { %371 = vrot.lane.b32.xlu1 %v1408_v4, %s1343_s12  ;;  %369 = vrot.lane.b32.xlu0 %v1410_v5, %s1343_s12 }
  0x87   :  { %311 = vrot.lane.b32.xlu1 %v1458_v12, %s1342_s11  ;;  %309 = vrot.lane.b32.xlu0 %v1462_v13, %s1342_s11 }
  0x8b   :  { %327 = vrot.lane.b32.xlu1 %v1470_v14, %s1342_s11  ;;  %325 = vrot.lane.b32.xlu0 %v1474_v15, %s1342_s11 }
  0x8f   :  { %359 = vrot.lane.b32.xlu1 %v1400_v2, %s1343_s12  ;;  %357 = vrot.lane.b32.xlu0 %v1392_v0, %s1343_s12 }
  0x93   :  { %375 = vrot.lane.b32.xlu1 %v1416_v6, %s1343_s12  ;;  %373 = vrot.lane.b32.xlu0 %v1418_v7, %s1343_s12 }
  0x97   :  { %387 = vrot.lane.b32.xlu1 %v1426_v8, %s1343_s12  ;;  %385 = vrot.lane.b32.xlu0 %v1430_v9, %s1343_s12 }
  0x99   :  { %v1556_v17 = vpop.permute.xlu1 %101  ;;  %v1558_v18 = vpop.permute.xlu0 %97 }
  0x9a   :  { %v109_v16 = vadd.f32 %v1558_v18, %v1394_v1 }
  0x9b   :  { %403 = vrot.lane.b32.xlu1 %v1438_v10, %s1343_s12  ;;  %401 = vrot.lane.b32.xlu0 %v1442_v11, %s1343_s12 }
  0x9d   :  { %v1564_v19 = vpop.permute.xlu1 %103  ;;  %v1566_v20 = vpop.permute.xlu0 %99 }
  0x9f   :  { %435 = vrot.lane.b32.xlu1 %v1402_v3, %s1345_s13  ;;  %433 = vrot.lane.b32.xlu0 %v1394_v1, %s1345_s13 }
  0xa1   :  { %v1572_v21 = vpop.permute.xlu1 %119  ;;  %v1574_v22 = vpop.permute.xlu0 %117 }
  0xa3   :  { %451 = vrot.lane.b32.xlu1 %v1408_v4, %s1345_s13  ;;  %449 = vrot.lane.b32.xlu0 %v1410_v5, %s1345_s13 }
  0xa5   :  { %v1580_v23 = vpop.permute.xlu1 %123  ;;  %v1582_v24 = vpop.permute.xlu0 %121 }
  0xa7   :  { %391 = vrot.lane.b32.xlu1 %v1458_v12, %s1343_s12  ;;  %389 = vrot.lane.b32.xlu0 %v1462_v13, %s1343_s12 }
  0xa9   :  { %v1588_v25 = vpop.permute.xlu1 %139  ;;  %v1590_v26 = vpop.permute.xlu0 %137 }
  0xab   :  { %407 = vrot.lane.b32.xlu1 %v1470_v14, %s1343_s12  ;;  %405 = vrot.lane.b32.xlu0 %v1474_v15, %s1343_s12 }
  0xad   :  { %v1596_v27 = vpop.permute.xlu1 %159  ;;  %v1598_v28 = vpop.permute.xlu0 %157 }
  0xae   :  { %2313 = vst [vmem:[#allocation12_spill] sm:$0xff] %v1596_v27  ;;  %v169_v63 = vadd.f32 %v1598_v28, %v1442_v11 }
  0xaf   :  { %439 = vrot.lane.b32.xlu1 %v1400_v2, %s1345_s13  ;;  %437 = vrot.lane.b32.xlu0 %v1392_v0, %s1345_s13 }
  0xb1   :  { %v1604_v29 = vpop.permute.xlu1 %195  ;;  %v1606_v30 = vpop.permute.xlu0 %193 }
  0xb3   :  { %455 = vrot.lane.b32.xlu1 %v1416_v6, %s1345_s13  ;;  %453 = vrot.lane.b32.xlu0 %v1418_v7, %s1345_s13 }
  0xb5   :  { %v1612_v31 = vpop.permute.xlu1 %211  ;;  %v1614_v32 = vpop.permute.xlu0 %209 }
  0xb7   :  { %467 = vrot.lane.b32.xlu1 %v1426_v8, %s1345_s13  ;;  %465 = vrot.lane.b32.xlu0 %v1430_v9, %s1345_s13 }
  0xb9   :  { %v1620_v33 = vpop.permute.xlu1 %143  ;;  %v1622_v34 = vpop.permute.xlu0 %141 }
  0xbb   :  { %483 = vrot.lane.b32.xlu1 %v1438_v10, %s1345_s13  ;;  %481 = vrot.lane.b32.xlu0 %v1442_v11, %s1345_s13 }
  0xbd   :  { %v1628_v35 = vpop.permute.xlu1 %163  ;;  %v1630_v36 = vpop.permute.xlu0 %161 }
  0xbf   :  { %515 = vrot.lane.b32.xlu1 %v1402_v3, %s1346_s14  ;;  %513 = vrot.lane.b32.xlu0 %v1394_v1, %s1346_s14  ;;  %v130_v1 = vadd.f32 %v1572_v21, %v1408_v4 }
  0xc1   :  { %v1636_v37 = vpop.permute.xlu1 %199  ;;  %v1638_v38 = vpop.permute.xlu0 %197 }
  0xc3   :  { %531 = vrot.lane.b32.xlu1 %v1408_v4, %s1346_s14  ;;  %529 = vrot.lane.b32.xlu0 %v1410_v5, %s1346_s14 }
  0xc5   :  { %v1644_v39 = vpop.permute.xlu1 %215  ;;  %v1646_v40 = vpop.permute.xlu0 %213 }
  0xc7   :  { %471 = vrot.lane.b32.xlu1 %v1458_v12, %s1345_s13  ;;  %469 = vrot.lane.b32.xlu0 %v1462_v13, %s1345_s13 }
  0xc9   :  { %v1652_v41 = vpop.permute.xlu1 %227  ;;  %v1654_v42 = vpop.permute.xlu0 %225 }
  0xcb   :  { %487 = vrot.lane.b32.xlu1 %v1470_v14, %s1345_s13  ;;  %485 = vrot.lane.b32.xlu0 %v1474_v15, %s1345_s13 }
  0xcd   :  { %v1660_v43 = vpop.permute.xlu1 %243  ;;  %v242_v44 = vpop.permute.xlu0 %241 }
  0xce   :  { %2314 = vst [vmem:[#allocation13_spill] sm:$0xff] %v1660_v43  ;;  %v110_v43 = vadd.f32 %v1566_v20, %v1402_v3  ;;  %v253_v27 = vadd.f32 %v242_v44, %v169_v63  ;;  %v129_v3 = vadd.f32 %v1574_v22, %v1410_v5 }
  0xcf   :  { %519 = vrot.lane.b32.xlu1 %v1400_v2, %s1346_s14  ;;  %517 = vrot.lane.b32.xlu0 %v1392_v0, %s1346_s14 }
  0xd1   :  { %v276_v45 = vpop.permute.xlu1 %275  ;;  %v274_v46 = vpop.permute.xlu0 %273 }
  0xd3   :  { %535 = vrot.lane.b32.xlu1 %v1416_v6, %s1346_s14  ;;  %533 = vrot.lane.b32.xlu0 %v1418_v7, %s1346_s14 }
  0xd5   :  { %v292_v47 = vpop.permute.xlu1 %291  ;;  %v290_v48 = vpop.permute.xlu0 %289 }
  0xd7   :  { %547 = vrot.lane.b32.xlu1 %v1426_v8, %s1346_s14  ;;  %545 = vrot.lane.b32.xlu0 %v1430_v9, %s1346_s14 }
  0xd9   :  { %v232_v49 = vpop.permute.xlu1 %231  ;;  %v230_v50 = vpop.permute.xlu0 %229 }
  0xdb   :  { %563 = vrot.lane.b32.xlu1 %v1438_v10, %s1346_s14  ;;  %561 = vrot.lane.b32.xlu0 %v1442_v11, %s1346_s14  ;;  %v205_v11 = vadd.f32 %v1606_v30, %v109_v16  ;;  %v222_v30 = vadd.f32 %v1612_v31, %v130_v1  ;;  %v151_v31 = vadd.f32 %v1622_v34, %v1462_v13 }
  0xdd   :  { %v1686_v53 = vpop.permute.xlu1 %247  ;;  %v1688_v54 = vpop.permute.xlu0 %245  ;;  %v285_v20 = vadd.f32 %v274_v46, %v205_v11  ;;  %v302_v4 = vadd.f32 %v292_v47, %v222_v30 }
  0xdf   :  { %179 = vrot.lane.b32.xlu1 %v1680_v51, %s1340_s10  ;;  %177 = vrot.lane.b32.xlu0 %v1684_v52, %s1340_s10 }
  0xe1   :  { %v1694_v55 = vpop.permute.xlu1 %279  ;;  %v1696_v56 = vpop.permute.xlu0 %277 }
  0xe3   :  { %551 = vrot.lane.b32.xlu1 %v1458_v12, %s1346_s14  ;;  %549 = vrot.lane.b32.xlu0 %v1462_v13, %s1346_s14  ;;  %v171_v13 = vadd.f32 %v1630_v36, %v1474_v15 }
  0xe5   :  { %v1702_v57 = vpop.permute.xlu1 %295  ;;  %v1704_v58 = vpop.permute.xlu0 %293 }
  0xe7   :  { %567 = vrot.lane.b32.xlu1 %v1470_v14, %s1346_s14  ;;  %565 = vrot.lane.b32.xlu0 %v1474_v15, %s1346_s14  ;;  %v255_v15 = vadd.f32 %v1688_v54, %v171_v13 }
  0xe9   :  { %v1718_v61 = vpop.permute.xlu1 %307  ;;  %v1720_v62 = vpop.permute.xlu0 %305 }
  0xea   :  { %2315 = vst [vmem:[#allocation14_spill] sm:$0xff] %v1718_v61  ;;  %2316 = vst [vmem:[#allocation15_spill] sm:$0xff] %v1720_v62  ;;  %v206_v62 = vadd.f32 %v1604_v29, %v110_v43 }
  0xeb   :  { %183 = vrot.lane.b32.xlu1 %v1712_v59, %s1340_s10  ;;  %181 = vrot.lane.b32.xlu0 %v1716_v60, %s1340_s10 }
  0xec   :  { %v286_v18 = vadd.f32 %v276_v45, %v206_v62  ;;  %v152_v45 = vadd.f32 %v1620_v33, %v1458_v12  ;;  %v172_v12 = vadd.f32 %v1628_v35, %v1470_v14 }
  0xed   :  { %v1732_v10 = vpop.permute.xlu1 %323  ;;  %v322_v61 = vpop.permute.xlu0 %321 }
  0xee   :  { %v1736_v28 = vadd.f32 %v322_v61, %v253_v27  ;;  %v221_v27 = vadd.f32 %v1614_v32, %v129_v3  ;;  %v240_v47 = vadd.f32 %v232_v49, %v152_v45  ;;  %v111_v49 = vadd.f32 %v1556_v17, %v1392_v0 }
  0xef   :  { %259 = vrot.lane.b32.xlu1 %v1680_v51, %s1341_s1  ;;  %257 = vrot.lane.b32.xlu0 %v1684_v52, %s1341_s1  ;;  %v256_v14 = vadd.f32 %v1686_v53, %v172_v12  ;;  %v132_v0 = vadd.f32 %v1580_v23, %v1416_v6  ;;  %v150_v6 = vadd.f32 %v1588_v25, %v1426_v8  ;;  %v51_v8 = vld [vmem:[%s2309_s2] sm:$0x1]  ;;  %v2318_v25 = vld [vmem:[#allocation12_spill] sm:$0xff] }
  0xf0   :  { %v301_v5 = vadd.f32 %v290_v48, %v221_v27  ;;  %v239_v48 = vadd.f32 %v230_v50, %v151_v31  ;;  %v112_v50 = vadd.f32 %v1564_v19, %v1400_v2  ;;  %v207_v11 = vadd.f32 %v1638_v38, %v111_v49 }
  0xf1   :  { %v356_v44 = vpop.permute.xlu1 %355  ;;  %v354_v29 = vpop.permute.xlu0 %353  ;;  %v131_v2 = vadd.f32 %v1582_v24, %v1418_v7  ;;  %v224_v53 = vadd.f32 %v1644_v39, %v132_v0  ;;  %v149_v7 = vadd.f32 %v1590_v26, %v1430_v9  ;;  %v2317_v9 = vld [vmem:[#allocation11_spill] sm:$0xff] }
  0xf2   :  { %v1748_v43 = vadd.f32 %v356_v44, %v286_v18  ;;  %v1750_v61 = vadd.f32 %v354_v29, %v285_v20  ;;  %v208_v16 = vadd.f32 %v1636_v37, %v112_v50  ;;  %v287_v19 = vadd.f32 %v1696_v56, %v207_v11 }
  0xf3   :  { %263 = vrot.lane.b32.xlu1 %v1712_v59, %s1341_s1  ;;  %261 = vrot.lane.b32.xlu0 %v1716_v60, %s1341_s1  ;;  %v223_v54 = vadd.f32 %v1646_v40, %v131_v2  ;;  %v304_v23 = vadd.f32 %v1702_v57, %v224_v53  ;;  %v238_v56 = vadd.f32 %v1652_v41, %v150_v6  ;;  %v2319_v41 = vld [vmem:[#allocation14_spill] sm:$0xff] }
  0xf4   :  { %v288_v17 = vadd.f32 %v1694_v55, %v208_v16  ;;  %v1125_v55 = vlaneseq  ;;  %v237_v44 = vadd.f32 %v1654_v42, %v149_v7  ;;  %v170_v26 = vadd.f32 %v2318_v25, %v2317_v9  ;;  %v2320_v42 = vld [vmem:[#allocation15_spill] sm:$0xff] }
  0xf5   :  { %v372_v21 = vpop.permute.xlu1 %371  ;;  %v370_v22 = vpop.permute.xlu0 %369  ;;  %v303_v24 = vadd.f32 %v1704_v58, %v223_v54  ;;  %v318_v57 = vadd.f32 %v2319_v41, %v238_v56 }
  0xf6   :  { %v1760_v32 = vadd.f32 %v372_v21, %v302_v4  ;;  %v1762_v46 = vadd.f32 %v370_v22, %v301_v5  ;;  %v317_v58 = vadd.f32 %v2320_v42, %v237_v44  ;;  %v57_v5 = vmul.f32 0.03, %v51_v8  ;;  %v2321_v21 = vld [vmem:[#allocation13_spill] sm:$0xff] }
  0xf7   :  { %339 = vrot.lane.b32.xlu1 %v1680_v51, %s1342_s11  ;;  %337 = vrot.lane.b32.xlu0 %v1684_v52, %s1342_s11  ;;  %v254_v22 = vadd.f32 %v2321_v21, %v170_v26 }
  0xf9   :  { %v312_v62 = vpop.permute.xlu1 %311  ;;  %v310_v63 = vpop.permute.xlu0 %309 }
  0xfa   :  { %v1772_v33 = vadd.f32 %v312_v62, %v240_v47  ;;  %v1774_v34 = vadd.f32 %v310_v63, %v239_v48  ;;  %v1126_v47 = vshrl.u32 %v1125_v55, 7  ;;  %v53_v48 = vmul.f32 0.01, %v51_v8  ;;  %v52_v63 = vld [vmem:[%s2309_s2 + $0x1] sm:$0x1]  ;;  %s1347_s2 = smov [#allocation7]  }
  0xfb   :  { %343 = vrot.lane.b32.xlu1 %v1712_v59, %s1342_s11  ;;  %341 = vrot.lane.b32.xlu0 %v1716_v60, %s1342_s11  ;;  %v334_v62 = vadd.f32 %v1732_v10, %v254_v22  ;;  %v58_v10 = vmul.f32 0.03, %v52_v63  ;;  %s1230_s19 = sshll.u32 %s1347_s2, 4  ;;  %s1231_s19 = int_to_ptr.vmem [resolvable:$true] %s1230_s19 }
  0xfc   :  { %s1308_s21 = scalar_lea.vmem %s1231_s19, 128  ;;  %p1313_p3 = scmp.lt.s32.totalorder %s1231_s19, %s1231_s19 }
  0xfd   :  { %v328_v35 = vpop.permute.xlu1 %327  ;;  %v326_v36 = vpop.permute.xlu0 %325  ;;  %p1309_p2 = scmp.ne.s32.totalorder %s1231_s19, %s1308_s21  ;;  %p1314_p4 = scmp.lt.s32.totalorder %s1308_s21, %s1308_s21 }
  0xfe   :  { %v1788_v1 = vadd.f32 %v328_v35, %v256_v14  ;;  %v1790_v3 = vadd.f32 %v326_v36, %v255_v15  ;;  %v59_v14 = vmul.f32 %v57_v5, %v57_v5  ;;  %v1127_v15 = vsub.s32 0, %v1126_v47 }
  0xff   :  { %419 = vrot.lane.b32.xlu1 %v1680_v51, %s1343_s12  ;;  %417 = vrot.lane.b32.xlu0 %v1684_v52, %s1343_s12  ;;  %v55_v35 = vmul.f32 %v53_v48, %v53_v48  ;;  %v54_v36 = vmul.f32 0.01, %v52_v63  ;;  %p1315_p5 = por %p1314_p4, %p1313_p3 }
 0x101   :  { %v360_v37 = vpop.permute.xlu1 %359  ;;  %v358_v38 = vpop.permute.xlu0 %357  ;;  %p1316_p6 = pnand %p1315_p5, %p1309_p2 }
 0x102   :  { %v1804_v18 = vadd.f32 %v360_v37, %v288_v17  ;;  %v1806_v20 = vadd.f32 %v358_v38, %v287_v19  ;;  %v1154_v17 = vrot.slane %v59_v14, %v1127_v15  ;;  %v56_v19 = vmul.f32 %v54_v36, %v54_v36 }
 0x103   :  { %423 = vrot.lane.b32.xlu1 %v1712_v59, %s1343_s12  ;;  %421 = vrot.lane.b32.xlu0 %v1716_v60, %s1343_s12  ;;  %v60_v37 = vmul.f32 %v58_v10, %v58_v10 }
 0x105   :  { %v376_v39 = vpop.permute.xlu1 %375  ;;  %v374_v40 = vpop.permute.xlu0 %373 }
 0x106   :  { %v1820_v29 = vadd.f32 %v376_v39, %v304_v23  ;;  %v1822_v30 = vadd.f32 %v374_v40, %v303_v24 }
 0x107   :  { %499 = vrot.lane.b32.xlu1 %v1680_v51, %s1345_s13  ;;  %497 = vrot.lane.b32.xlu0 %v1684_v52, %s1345_s13 }
 0x109   :  { %v388_v27 = vpop.permute.xlu1 %387  ;;  %v386_v4 = vpop.permute.xlu0 %385 }
 0x10a   :  { %v398_v45 = vadd.f32 %v388_v27, %v318_v57  ;;  %v397_v31 = vadd.f32 %v386_v4, %v317_v58 }
 0x10b   :  { %503 = vrot.lane.b32.xlu1 %v1712_v59, %s1345_s13  ;;  %501 = vrot.lane.b32.xlu0 %v1716_v60, %s1345_s13 }
 0x10d   :  { %v404_v12 = vpop.permute.xlu1 %403  ;;  %v402_v13 = vpop.permute.xlu0 %401 }
 0x10e   :  { %v414_v49 = vadd.f32 %v404_v12, %v334_v62  ;;  %v413_v50 = vadd.f32 %v402_v13, %v1736_v28  ;;  %v1128_v28 = vrot.slane %v55_v35, %v1127_v15 }
 0x10f   :  { %579 = vrot.lane.b32.xlu1 %v1680_v51, %s1346_s14  ;;  %577 = vrot.lane.b32.xlu0 %v1684_v52, %s1346_s14 }
 0x111   :  { %v436_v16 = vpop.permute.xlu1 %435  ;;  %v434_v11 = vpop.permute.xlu0 %433 }
 0x112   :  { %v446_v0 = vadd.f32 %v436_v16, %v1748_v43  ;;  %v445_v2 = vadd.f32 %v434_v11, %v1750_v61  ;;  %v1132_v43 = vrot.slane %v56_v19, %v1127_v15  ;;  %v1158_v61 = vrot.slane %v60_v37, %v1127_v15 }
 0x113   :  { %583 = vrot.lane.b32.xlu1 %v1712_v59, %s1346_s14  ;;  %581 = vrot.lane.b32.xlu0 %v1716_v60, %s1346_s14 }
 0x115   :  { %v452_v38 = vpop.permute.xlu1 %451  ;;  %v450_v53 = vpop.permute.xlu0 %449 }
 0x116   :  { %v462_v54 = vadd.f32 %v452_v38, %v1760_v32  ;;  %v461_v6 = vadd.f32 %v450_v53, %v1762_v46 }
 0x117   :  { %1160 = vperm.xlu1 %1255, %v1154_v17   ;;  %1134 = vperm.xlu0 %1254, %v1128_v28  }
 0x119   :  { %v392_v7 = vpop.permute.xlu1 %391  ;;  %v390_v23 = vpop.permute.xlu0 %389 }
 0x11a   :  { %v1858_v24 = vadd.f32 %v392_v7, %v1772_v33  ;;  %v1861_v39 = vadd.f32 %v390_v23, %v1774_v34 }
 0x11b   :  { %1138 = vperm.xlu1 %1255, %v1132_v43   ;;  %1164 = vperm.xlu0 %1254, %v1158_v61  }
 0x11d   :  { %v408_v40 = vpop.permute.xlu1 %407  ;;  %v406_v55 = vpop.permute.xlu0 %405 }
 0x11e   :  { %v1864_v32 = vadd.f32 %v408_v40, %v1788_v1  ;;  %v1867_v46 = vadd.f32 %v406_v55, %v1790_v3 }
 0x121   :  { %v440_v56 = vpop.permute.xlu1 %439  ;;  %v438_v44 = vpop.permute.xlu0 %437 }
 0x122   :  { %v1870_v8 = vadd.f32 %v440_v56, %v1804_v18  ;;  %v1873_v33 = vadd.f32 %v438_v44, %v1806_v20 }
 0x125   :  { %v456_v34 = vpop.permute.xlu1 %455  ;;  %v454_v9 = vpop.permute.xlu0 %453 }
 0x126   :  { %v1876_v25 = vadd.f32 %v456_v34, %v1820_v29  ;;  %v1879_v26 = vadd.f32 %v454_v9, %v1822_v30 }
 0x129   :  { %v468_v1 = vpop.permute.xlu1 %467  ;;  %v466_v41 = vpop.permute.xlu0 %465 }
 0x12a   :  { %v1881_v3 = vadd.f32 %v468_v1, %v398_v45  ;;  %v1883_v57 = vadd.f32 %v466_v41, %v397_v31 }
 0x12d   :  { %v484_v42 = vpop.permute.xlu1 %483  ;;  %v482_v18 = vpop.permute.xlu0 %481 }
 0x12e   :  { %v1885_v58 = vadd.f32 %v484_v42, %v414_v49  ;;  %v1887_v20 = vadd.f32 %v482_v18, %v413_v50 }
 0x131   :  { %v516_v27 = vpop.permute.xlu1 %515  ;;  %v514_v4 = vpop.permute.xlu0 %513 }
 0x132   :  { %v1889_v5 = vadd.f32 %v516_v27, %v446_v0  ;;  %v1891_v29 = vadd.f32 %v514_v4, %v445_v2 }
 0x134   :  { %v619_v30 = vrot.slane %v1889_v5, 1  ;;  %v706_v21 = vrot.slane %v1889_v5, 2  ;;  %v618_v22 = vrot.slane %v1891_v29, 1  ;;  %v705_v45 = vrot.slane %v1891_v29, 2 }
 0x135   :  { %v776_v31 = vrot.slane %v1891_v29, 3  ;;  %v847_v47 = vrot.slane %v1891_v29, 4  ;;  %v532_v48 = vpop.permute.xlu1 %531  ;;  %v530_v62 = vpop.permute.xlu0 %529  ;;  %v777_v63 = vrot.slane %v1889_v5, 3  ;;  %v848_v12 = vrot.slane %v1889_v5, 4 }
 0x136   :  { %v629_v13 = vadd.f32 %v619_v30, %v1889_v5  ;;  %v620_v49 = vsel %vm617_vm0, %v618_v22, %v619_v30  ;;  %v1903_v50 = vadd.f32 %v532_v48, %v462_v54  ;;  %v541_v14 = vadd.f32 %v530_v62, %v461_v6 }
 0x137   :  { %v628_v15 = vadd.f32 %v620_v49, %v1891_v29  ;;  %v707_v35 = vsel %vm704_vm1, %v705_v45, %v706_v21  ;;  %v778_v36 = vsel %vm775_vm2, %v776_v31, %v777_v63  ;;  %v849_v10 = vsel %vm846_vm3, %v847_v47, %v848_v12 }
 0x138   :  { %v637_v16 = vrot.slane %v1903_v50, 1  ;;  %v720_v11 = vrot.slane %v1903_v50, 2  ;;  %v636_v0 = vrot.slane %v541_v14, 1  ;;  %v719_v2 = vrot.slane %v541_v14, 2 }
 0x139   :  { %v790_v17 = vrot.slane %v541_v14, 3  ;;  %v861_v28 = vrot.slane %v541_v14, 4  ;;  %v472_v19 = vpop.permute.xlu1 %471  ;;  %v470_v37 = vpop.permute.xlu0 %469  ;;  %v791_v38 = vrot.slane %v1903_v50, 3  ;;  %v862_v53 = vrot.slane %v1903_v50, 4 }
 0x13a   :  { %v647_v54 = vadd.f32 %v637_v16, %v1903_v50  ;;  %v638_v6 = vsel %vm617_vm0, %v636_v0, %v637_v16  ;;  %v1916_v43 = vadd.f32 %v472_v19, %v1858_v24  ;;  %v1919_v7 = vadd.f32 %v470_v37, %v1861_v39 }
 0x13b   :  { %v646_v61 = vadd.f32 %v638_v6, %v541_v14  ;;  %v933_v23 = vrot.slane %v1903_v50, 5  ;;  %v715_v40 = vadd.f32 %v707_v35, %v628_v15  ;;  %v716_v56 = vadd.f32 %v706_v21, %v629_v13 }
 0x13c   :  { %v730_v55 = vadd.f32 %v720_v11, %v647_v54  ;;  %v721_v44 = vsel %vm704_vm1, %v719_v2, %v720_v11  ;;  %v792_v34 = vsel %vm775_vm2, %v790_v17, %v791_v38  ;;  %v863_v24 = vsel %vm846_vm3, %v861_v28, %v862_v53 }
 0x13d   :  { %v488_v9 = vpop.permute.xlu1 %487  ;;  %v486_v1 = vpop.permute.xlu0 %485  ;;  %v729_v41 = vadd.f32 %v721_v44, %v646_v61  ;;  %v786_v42 = vadd.f32 %v778_v36, %v715_v40  ;;  %v918_v18 = vrot.slane %v1891_v29, 5  ;;  %v1004_v4 = vrot.slane %v1903_v50, 6 }
 0x13e   :  { %v1927_v39 = vadd.f32 %v488_v9, %v1864_v32  ;;  %v801_v27 = vadd.f32 %v791_v38, %v730_v55  ;;  %v787_v30 = vadd.f32 %v777_v63, %v716_v56  ;;  %v919_v45 = vrot.slane %v1889_v5, 5 }
 0x13f   :  { %v800_v21 = vadd.f32 %v792_v34, %v729_v41  ;;  %v857_v22 = vadd.f32 %v849_v10, %v786_v42  ;;  %v932_v31 = vrot.slane %v541_v14, 5  ;;  %v989_v62 = vrot.slane %v1891_v29, 6 }
 0x140   :  { %v872_v47 = vadd.f32 %v862_v53, %v801_v27  ;;  %v858_v48 = vadd.f32 %v848_v12, %v787_v30  ;;  %v990_v13 = vrot.slane %v1889_v5, 6  ;;  %v920_v32 = vsel %vm917_vm4, %v918_v18, %v919_v45 }
 0x141   :  { %v520_v49 = vpop.permute.xlu1 %519  ;;  %v518_v15 = vpop.permute.xlu0 %517  ;;  %v871_v35 = vadd.f32 %v863_v24, %v800_v21  ;;  %v934_v36 = vsel %vm917_vm4, %v932_v31, %v933_v23  ;;  %v1003_v50 = vrot.slane %v541_v14, 6  ;;  %v928_v12 = vadd.f32 %v920_v32, %v857_v22 }
 0x142   :  { %v1936_v63 = vadd.f32 %v520_v49, %v1870_v8  ;;  %v1939_v10 = vadd.f32 %v518_v15, %v1873_v33  ;;  %v943_v16 = vadd.f32 %v933_v23, %v872_v47  ;;  %v929_v11 = vadd.f32 %v919_v45, %v858_v48 }
 0x143   :  { %v942_v29 = vadd.f32 %v934_v36, %v871_v35  ;;  %v991_v5 = vsel %vm988_vm5, %v989_v62, %v990_v13  ;;  %v1005_v0 = vsel %vm988_vm5, %v1003_v50, %v1004_v4  ;;  %v1944_v2 = vadd.f32 %v486_v1, %v1867_v46 }
 0x144   :  { %v622_v17 = vrot.slane %v1936_v63, 1  ;;  %v621_v14 = vrot.slane %v1939_v10, 1  ;;  %v708_v8 = vrot.slane %v1939_v10, 2  ;;  %v1014_v19 = vadd.f32 %v1004_v4, %v943_v16 }
 0x145   :  { %v536_v28 = vpop.permute.xlu1 %535  ;;  %v534_v33 = vpop.permute.xlu0 %533  ;;  %v999_v37 = vadd.f32 %v991_v5, %v928_v12  ;;  %v1000_v38 = vadd.f32 %v990_v13, %v929_v11  ;;  %v1013_v53 = vadd.f32 %v1005_v0, %v942_v29 }
 0x146   :  { %v1951_v6 = vadd.f32 %v536_v28, %v1876_v25  ;;  %v1954_v46 = vadd.f32 %v534_v33, %v1879_v26  ;;  %v1957_v61 = vadd.f32 %v622_v17, %v1936_v63  ;;  %v1959_v23 = vmul.f32 0.020408163, %v1014_v19 }
 0x147   :  { %v1059_v40 = vmul.f32 0.020408163, %v999_v37  ;;  %v1060_v55 = vmul.f32 0.020408163, %v1000_v38  ;;  %v1962_v56 = vsel %vm617_vm0, %v621_v14, %v622_v17  ;;  %v1966_v9 = vmul.f32 0.020408163, %v1013_v53 }
 0x148   :  { %v639_v44 = vrot.slane %v1954_v46, 1  ;;  %v709_v25 = vrot.slane %v1936_v63, 2  ;;  %v1971_v41 = vmul.f32 %v1959_v23, %v1959_v23  ;;  %v640_v18 = vrot.slane %v1951_v6, 1 }
 0x149   :  { %v548_v26 = vpop.permute.xlu1 %547  ;;  %v546_v1 = vpop.permute.xlu0 %545  ;;  %v1973_v42 = vmul.f32 %v1060_v55, %v1060_v55  ;;  %v1976_v24 = vmul.f32 %v1959_v23, %v1060_v55  ;;  %v1985_v30 = vmul.f32 %v1059_v40, %v1059_v40  ;;  %v1988_v21 = vmul.f32 %v1966_v9, %v1059_v40 }
 0x14a   :  { %v1980_v27 = vadd.f32 %v548_v26, %v1881_v3  ;;  %v1983_v4 = vadd.f32 %v546_v1, %v1883_v57  ;;  %v1992_v22 = vmul.f32 %v1966_v9, %v1966_v9  ;;  %v1994_v45 = vmul.f32 2.0, %v1059_v40 }
 0x14b   :  { %v1996_v31 = vmul.f32 2.0, %v1060_v55  ;;  %v2000_v3 = vadd.f32 %v1971_v41, %v1973_v42  ;;  %v2012_v36 = vadd.f32 %v640_v18, %v1951_v6 }
 0x14c   :  { %v654_v57 = vrot.slane %v1983_v4, 1  ;;  %v733_v47 = vrot.slane %v1983_v4, 2  ;;  %v655_v48 = vrot.slane %v1980_v27, 1  ;;  %v734_v62 = vrot.slane %v1980_v27, 2 }
 0x14d   :  { %v564_v13 = vpop.permute.xlu1 %563  ;;  %v562_v49 = vpop.permute.xlu0 %561  ;;  %v805_v15 = vrot.slane %v1980_v27, 3  ;;  %v876_v35 = vrot.slane %v1980_v27, 4  ;;  %v947_v32 = vrot.slane %v1980_v27, 5  ;;  %v1018_v29 = vrot.slane %v1980_v27, 6 }
 0x14e   :  { %v2015_v50 = vadd.f32 %v564_v13, %v1885_v58  ;;  %v2018_v16 = vadd.f32 %v562_v49, %v1887_v20  ;;  %v665_v12 = vadd.f32 %v655_v48, %v1980_v27  ;;  %v656_v11 = vsel %vm617_vm0, %v654_v57, %v655_v48 }
 0x14f   :  { %v664_v5 = vadd.f32 %v656_v11, %v1983_v4  ;;  %v735_v0 = vsel %vm704_vm1, %v733_v47, %v734_v62  ;;  %v804_v17 = vrot.slane %v1983_v4, 3  ;;  %v875_v40 = vrot.slane %v1983_v4, 4 }
 0x150   :  { %v672_v14 = vrot.slane %v2018_v16, 1  ;;  %v747_v58 = vrot.slane %v2018_v16, 2  ;;  %v673_v28 = vrot.slane %v2015_v50, 1  ;;  %v744_v20 = vadd.f32 %v734_v62, %v665_v12 }
 0x151   :  { %v180_v33 = vpop.permute.xlu1 %179  ;;  %v178_v19 = vpop.permute.xlu0 %177  ;;  %v748_v37 = vrot.slane %v2015_v50, 2  ;;  %v819_v38 = vrot.slane %v2015_v50, 3  ;;  %v890_v53 = vrot.slane %v2015_v50, 4  ;;  %v961_v27 = vrot.slane %v2015_v50, 5 }
 0x152   :  { %v2034_v55 = vadd.f32 %v180_v33, %v1680_v51  ;;  %v683_v26 = vadd.f32 %v673_v28, %v2015_v50  ;;  %v815_v1 = vadd.f32 %v805_v15, %v744_v20  ;;  %v2039_v57 = vadd.f32 %v178_v19, %v1684_v52 }
 0x153   :  { %v674_v47 = vsel %vm617_vm0, %v672_v14, %v673_v28  ;;  %v743_v48 = vadd.f32 %v735_v0, %v664_v5  ;;  %v749_v62 = vsel %vm704_vm1, %v747_v58, %v748_v37  ;;  %v806_v51 = vsel %vm775_vm2, %v804_v17, %v805_v15 }
 0x154   :  { %v758_v13 = vadd.f32 %v748_v37, %v683_v26  ;;  %v886_v49 = vadd.f32 %v876_v35, %v815_v1  ;;  %v682_v12 = vadd.f32 %v674_v47, %v2018_v16  ;;  %v818_v20 = vrot.slane %v2018_v16, 3 }
 0x155   :  { %v552_v11 = vpop.permute.xlu1 %551  ;;  %v550_v33 = vpop.permute.xlu0 %549  ;;  %v814_v54 = vadd.f32 %v806_v51, %v743_v48  ;;  %v877_v34 = vsel %vm846_vm3, %v875_v40, %v876_v35  ;;  %v889_v52 = vrot.slane %v2018_v16, 4  ;;  %v1032_v58 = vrot.slane %v2015_v50, 6 }
 0x156   :  { %v2049_v14 = vadd.f32 %v550_v33, %v1919_v7  ;;  %v829_v5 = vadd.f32 %v819_v38, %v758_v13  ;;  %v957_v0 = vadd.f32 %v947_v32, %v886_v49  ;;  %v757_v28 = vadd.f32 %v749_v62, %v682_v12 }
 0x157   :  { %v820_v19 = vsel %vm775_vm2, %v818_v20, %v819_v38  ;;  %v885_v15 = vadd.f32 %v877_v34, %v814_v54  ;;  %v891_v17 = vsel %vm846_vm3, %v889_v52, %v890_v53  ;;  %v2055_v37 = vadd.f32 %v552_v11, %v1916_v43 }
 0x158   :  { %v900_v26 = vadd.f32 %v890_v53, %v829_v5  ;;  %v1028_v35 = vadd.f32 %v1018_v29, %v957_v0  ;;  %v946_v40 = vrot.slane %v1983_v4, 5  ;;  %v828_v47 = vadd.f32 %v820_v19, %v757_v28 }
 0x159   :  { %v568_v1 = vpop.permute.xlu1 %567  ;;  %v566_v7 = vpop.permute.xlu0 %565  ;;  %v960_v48 = vrot.slane %v2018_v16, 5  ;;  %v1017_v50 = vrot.slane %v1983_v4, 6  ;;  %v1031_v62 = vrot.slane %v2018_v16, 6  ;;  %v657_v54 = vrot.slane %v2049_v14, 1 }
 0x15a   :  { %v2063_v34 = vadd.f32 %v566_v7, %v1944_v2  ;;  %v971_v43 = vadd.f32 %v961_v27, %v900_v26  ;;  %v1068_v38 = vmul.f32 0.020408163, %v1028_v35  ;;  %v899_v53 = vadd.f32 %v891_v17, %v828_v47 }
 0x15b   :  { %v948_v13 = vsel %vm917_vm4, %v946_v40, %v947_v32  ;;  %v962_v49 = vsel %vm917_vm4, %v960_v48, %v961_v27  ;;  %v1019_v12 = vsel %vm988_vm5, %v1017_v50, %v1018_v29  ;;  %v2069_v51 = vadd.f32 %v568_v1, %v1927_v39 }
 0x15c   :  { %v1042_v4 = vadd.f32 %v1032_v58, %v971_v43  ;;  %v956_v11 = vadd.f32 %v948_v13, %v885_v15  ;;  %v1033_v16 = vsel %vm988_vm5, %v1031_v62, %v1032_v58  ;;  %v970_v2 = vadd.f32 %v962_v49, %v899_v53 }
 0x15d   :  { %v184_v33 = vpop.permute.xlu1 %183  ;;  %v182_v20 = vpop.permute.xlu0 %181  ;;  %v1084_v52 = vsub.f32 %v1068_v38, %v1973_v42  ;;  %v2075_v5 = vmul.f32 %v1994_v45, %v1966_v9  ;;  %v2079_v32 = vmul.f32 %v1996_v31, %v1959_v23  ;;  %v675_v39 = vrot.slane %v2063_v34, 1 }
 0x15e   :  { %v192_v29 = vadd.f32 %v184_v33, %v1712_v59  ;;  %v1072_v27 = vmul.f32 0.020408163, %v1042_v4  ;;  %v1027_v0 = vadd.f32 %v1019_v12, %v956_v11  ;;  %v191_v58 = vadd.f32 %v182_v20, %v1716_v60 }
 0x15f   :  { %v1041_v28 = vadd.f32 %v1033_v16, %v970_v2  ;;  %v2086_v42 = vadd.f32 %v1992_v22, %v1985_v30  ;;  %v718_v9 = vadd.f32 %v709_v25, %v1957_v61  ;;  %v1088_v31 = vmul.f32 1.0208334, %v1084_v52 }
 0x160   :  { %v1096_v23 = vsub.f32 %v1072_v27, %v1971_v41  ;;  %v1067_v45 = vmul.f32 0.020408163, %v1027_v0  ;;  %v723_v19 = vrot.slane %v1951_v6, 2  ;;  %v780_v60 = vrot.slane %v1936_v63, 3 }
 0x161   :  { %v260_v59 = vpop.permute.xlu1 %259  ;;  %v258_v15 = vpop.permute.xlu0 %257  ;;  %v1071_v17 = vmul.f32 0.020408163, %v1041_v28  ;;  %v794_v26 = vrot.slane %v1951_v6, 3  ;;  %v851_v35 = vrot.slane %v1936_v63, 4  ;;  %v865_v41 = vrot.slane %v1951_v6, 4 }
 0x162   :  { %v270_v40 = vadd.f32 %v260_v59, %v2034_v55  ;;  %v1100_v1 = vmul.f32 1.0208334, %v1096_v23  ;;  %v1083_v61 = vsub.f32 %v1067_v45, %v1985_v30  ;;  %v269_v7 = vadd.f32 %v258_v15, %v2039_v57 }
 0x163   :  { %v1095_v47 = vsub.f32 %v1071_v17, %v1992_v22  ;;  %v732_v48 = vadd.f32 %v723_v19, %v2012_v36  ;;  %v789_v50 = vadd.f32 %v780_v60, %v718_v9  ;;  %v922_v38 = vrot.slane %v1936_v63, 5 }
 0x164   :  { %v1087_v62 = vmul.f32 1.0208334, %v1083_v61  ;;  %v2102_v43 = vadd.f32 %v1100_v1, %v1088_v31  ;;  %v936_v53 = vrot.slane %v1951_v6, 5  ;;  %v993_v4 = vrot.slane %v1936_v63, 6 }
 0x165   :  { %v264_v55 = vpop.permute.xlu1 %263  ;;  %v262_v13 = vpop.permute.xlu0 %261  ;;  %v1099_v49 = vmul.f32 1.0208334, %v1095_v47  ;;  %v803_v30 = vadd.f32 %v794_v26, %v732_v48  ;;  %v860_v12 = vadd.f32 %v851_v35, %v789_v50  ;;  %v1007_v22 = vrot.slane %v1951_v6, 6 }
 0x166   :  { %v272_v57 = vadd.f32 %v264_v55, %v192_v29  ;;  %v630_v36 = vadd.f32 %v1962_v56, %v1939_v10  ;;  %v641_v11 = vsel %vm617_vm0, %v639_v44, %v640_v18  ;;  %v710_v52 = vsel %vm704_vm1, %v708_v8, %v709_v25 }
 0x167   :  { %v2115_v16 = vadd.f32 %v1099_v49, %v1087_v62  ;;  %v874_v33 = vadd.f32 %v865_v41, %v803_v30  ;;  %v931_v20 = vadd.f32 %v922_v38, %v860_v12  ;;  %v648_v2 = vadd.f32 %v641_v11, %v1954_v46 }
 0x168   :  { %v2322_v56 = vrot.slane %v1954_v46, 2  ;;  %v2323_v29 = vrot.slane %v1939_v10, 3  ;;  %v793_v18 = vrot.slane %v1954_v46, 3  ;;  %v717_v23 = vadd.f32 %v710_v52, %v630_v36 }
 0x169   :  { %v340_v27 = vpop.permute.xlu1 %339  ;;  %v338_v0 = vpop.permute.xlu0 %337  ;;  %v945_v28 = vadd.f32 %v936_v53, %v874_v33  ;;  %v1002_v9 = vadd.f32 %v993_v4, %v931_v20  ;;  %v271_v45 = vadd.f32 %v262_v13, %v191_v58  ;;  %v850_v25 = vrot.slane %v1939_v10, 4 }
 0x16a   :  { %v724_v6 = vsel %vm704_vm1, %v2322_v56, %v723_v19  ;;  %v781_v44 = vsel %vm775_vm2, %v2323_v29, %v780_v60  ;;  %v350_v31 = vadd.f32 %v340_v27, %v270_v40  ;;  %v795_v8 = vsel %vm775_vm2, %v793_v18, %v794_v26 }
 0x16b   :  { %v731_v63 = vadd.f32 %v724_v6, %v648_v2  ;;  %v1016_v59 = vadd.f32 %v1007_v22, %v945_v28  ;;  %v2132_v19 = vmul.f32 0.020408163, %v1002_v9  ;;  %v788_v15 = vadd.f32 %v781_v44, %v717_v23 }
 0x16c   :  { %v852_v60 = vsel %vm846_vm3, %v850_v25, %v851_v35  ;;  %v864_v1 = vrot.slane %v1954_v46, 4  ;;  %v921_v61 = vrot.slane %v1939_v10, 5  ;;  %v935_v47 = vrot.slane %v1954_v46, 5 }
 0x16d   :  { %v802_v17 = vadd.f32 %v795_v8, %v731_v63  ;;  %v349_v48 = vadd.f32 %v338_v0, %v269_v7  ;;  %v344_v58 = vpop.permute.xlu1 %343  ;;  %v342_v40 = vpop.permute.xlu0 %341  ;;  %v2138_v50 = vmul.f32 0.020408163, %v1016_v59  ;;  %v1118_v26 = vmul.f32 2.0, %v2132_v19 }
 0x16e   :  { %v859_v62 = vadd.f32 %v852_v60, %v788_v15  ;;  %v352_v55 = vadd.f32 %v344_v58, %v272_v57  ;;  %v2143_v13 = vmul.f32 %v2132_v19, %v2132_v19  ;;  %v866_v35 = vsel %vm846_vm3, %v864_v1, %v865_v41 }
 0x16f   :  { %v923_v49 = vsel %vm917_vm4, %v921_v61, %v922_v38  ;;  %v2149_v30 = vmul.f32 %v2138_v50, %v2138_v50  ;;  %v2152_v7 = vmul.f32 %v1118_v26, %v2138_v50  ;;  %v873_v12 = vadd.f32 %v866_v35, %v802_v17 }
 0x170   :  { %v930_v36 = vadd.f32 %v923_v49, %v859_v62  ;;  %v937_v11 = vsel %vm917_vm4, %v935_v47, %v936_v53  ;;  %v992_v57 = vrot.slane %v1939_v10, 6  ;;  %v1006_v33 = vrot.slane %v1954_v46, 6 }
 0x171   :  { %v658_v20 = vrot.slane %v2055_v37, 1  ;;  %v351_v41 = vadd.f32 %v342_v40, %v271_v45  ;;  %v420_v2 = vpop.permute.xlu1 %419  ;;  %v418_v38 = vpop.permute.xlu0 %417  ;;  %v2160_v52 = vadd.f32 %v2149_v30, %v2143_v13  ;;  %v944_v56 = vadd.f32 %v937_v11, %v873_v12 }
 0x172   :  { %v676_v6 = vrot.slane %v2069_v51, 1  ;;  %v430_v29 = vadd.f32 %v420_v2, %v350_v31  ;;  %v994_v44 = vsel %vm988_vm5, %v992_v57, %v993_v4  ;;  %v1008_v53 = vsel %vm988_vm5, %v1006_v33, %v1007_v22 }
 0x173   :  { %v736_v10 = vrot.slane %v2049_v14, 2  ;;  %v1001_v46 = vadd.f32 %v994_v44, %v930_v36  ;;  %v1015_v18 = vadd.f32 %v1008_v53, %v944_v56  ;;  %v659_v27 = vsel %vm617_vm0, %v657_v54, %v658_v20 }
 0x174   :  { %v667_v0 = vadd.f32 %v658_v20, %v2055_v37  ;;  %v429_v28 = vadd.f32 %v418_v38, %v349_v48  ;;  %v666_v9 = vadd.f32 %v659_v27, %v2049_v14  ;;  %v677_v23 = vsel %vm617_vm0, %v675_v39, %v676_v6 }
 0x175   :  { %v737_v4 = vrot.slane %v2055_v37, 2  ;;  %v424_v22 = vpop.permute.xlu1 %423  ;;  %v422_v63 = vpop.permute.xlu0 %421  ;;  %v2175_v45 = vmul.f32 0.020408163, %v1001_v46  ;;  %v2177_v31 = vmul.f32 0.020408163, %v1015_v18  ;;  %v684_v8 = vadd.f32 %v677_v23, %v2063_v34 }
 0x176   :  { %v685_v54 = vadd.f32 %v676_v6, %v2069_v51  ;;  %v432_v25 = vadd.f32 %v424_v22, %v352_v55  ;;  %v750_v17 = vrot.slane %v2063_v34, 2  ;;  %v751_v47 = vrot.slane %v2069_v51, 2 }
 0x177   :  { %v738_v59 = vsel %vm704_vm1, %v736_v10, %v737_v4  ;;  %v746_v15 = vadd.f32 %v737_v4, %v667_v0  ;;  %v2185_v39 = vmul.f32 %v2175_v45, %v2175_v45  ;;  %v2189_v60 = vmul.f32 %v2177_v31, %v2177_v31 }
 0x178   :  { %v1117_v1 = vmul.f32 2.0, %v2175_v45  ;;  %v745_v61 = vadd.f32 %v738_v59, %v666_v9  ;;  %v807_v48 = vrot.slane %v2049_v14, 3  ;;  %v808_v58 = vrot.slane %v2055_v37, 3 }
 0x179   :  { %v821_v40 = vrot.slane %v2063_v34, 3  ;;  %v431_v26 = vadd.f32 %v422_v63, %v351_v41  ;;  %v500_v62 = vpop.permute.xlu1 %499  ;;  %v498_v55 = vpop.permute.xlu0 %497  ;;  %v2201_v49 = vadd.f32 %v2189_v60, %v2185_v39  ;;  %v822_v12 = vrot.slane %v2069_v51, 3 }
 0x17a   :  { %v2197_v35 = vmul.f32 %v1117_v1, %v2177_v31  ;;  %v510_v36 = vadd.f32 %v500_v62, %v430_v29  ;;  %v752_v11 = vsel %vm704_vm1, %v750_v17, %v751_v47  ;;  %v760_v57 = vadd.f32 %v751_v47, %v685_v54 }
 0x17b   :  { %v878_v33 = vrot.slane %v2049_v14, 4  ;;  %v759_v20 = vadd.f32 %v752_v11, %v684_v8  ;;  %v809_v41 = vsel %vm775_vm2, %v807_v48, %v808_v58  ;;  %v817_v2 = vadd.f32 %v808_v58, %v746_v15 }
 0x17c   :  { %v823_v38 = vsel %vm775_vm2, %v821_v40, %v822_v12  ;;  %v816_v56 = vadd.f32 %v809_v41, %v745_v61  ;;  %v831_v6 = vadd.f32 %v822_v12, %v760_v57  ;;  %v879_v44 = vrot.slane %v2055_v37, 4 }
 0x17d   :  { %v892_v53 = vrot.slane %v2063_v34, 4  ;;  %v504_v10 = vpop.permute.xlu1 %503  ;;  %v502_v46 = vpop.permute.xlu0 %501  ;;  %v830_v29 = vadd.f32 %v823_v38, %v759_v20  ;;  %v893_v18 = vrot.slane %v2069_v51, 4  ;;  %v949_v27 = vrot.slane %v2049_v14, 5 }
 0x17e   :  { %v950_v0 = vrot.slane %v2055_v37, 5  ;;  %v509_v9 = vadd.f32 %v498_v55, %v429_v28  ;;  %v512_v23 = vadd.f32 %v504_v10, %v432_v25  ;;  %v880_v4 = vsel %vm846_vm3, %v878_v33, %v879_v44 }
 0x17f   :  { %v888_v22 = vadd.f32 %v879_v44, %v817_v2  ;;  %v887_v63 = vadd.f32 %v880_v4, %v816_v56  ;;  %v894_v8 = vsel %vm846_vm3, %v892_v53, %v893_v18  ;;  %v902_v54 = vadd.f32 %v893_v18, %v831_v6 }
 0x180   :  { %v951_v59 = vsel %vm917_vm4, %v949_v27, %v950_v0  ;;  %v901_v15 = vadd.f32 %v894_v8, %v830_v29  ;;  %v963_v1 = vrot.slane %v2063_v34, 5  ;;  %v964_v61 = vrot.slane %v2069_v51, 5 }
 0x181   :  { %v959_v17 = vadd.f32 %v950_v0, %v888_v22  ;;  %v511_v47 = vadd.f32 %v502_v46, %v431_v26  ;;  %v580_v48 = vpop.permute.xlu1 %579  ;;  %v578_v58 = vpop.permute.xlu0 %577  ;;  %v2218_v28 = vadd.f32 %v951_v59, %v887_v63  ;;  %v1020_v25 = vrot.slane %v2049_v14, 6 }
 0x182   :  { %v1021_v40 = vrot.slane %v2055_v37, 6  ;;  %v590_v62 = vadd.f32 %v580_v48, %v510_v36  ;;  %v589_v55 = vadd.f32 %v578_v58, %v509_v9  ;;  %v965_v12 = vsel %vm917_vm4, %v963_v1, %v964_v61 }
 0x183   :  { %v1034_v11 = vrot.slane %v2063_v34, 6  ;;  %v2224_v57 = vadd.f32 %v965_v12, %v901_v15  ;;  %v2226_v33 = vadd.f32 %v964_v61, %v902_v54  ;;  %v1035_v14 = vrot.slane %v2069_v51, 6 }
 0x184   :  { %v1022_v26 = vsel %vm988_vm5, %v1020_v25, %v1021_v40  ;;  %v2229_v20 = vadd.f32 %v1021_v40, %v959_v17  ;;  %v690_v41 = vrot.slane %v589_v55, 1  ;;  %v691_v2 = vrot.slane %v590_v62, 1 }
 0x185   :  { %v762_v38 = vrot.slane %v590_v62, 2  ;;  %v584_v37 = vpop.permute.xlu1 %583  ;;  %v582_v36 = vpop.permute.xlu0 %581  ;;  %v833_v56 = vrot.slane %v590_v62, 3  ;;  %v904_v6 = vrot.slane %v590_v62, 4  ;;  %v975_v44 = vrot.slane %v590_v62, 5 }
 0x186   :  { %v761_v53 = vrot.slane %v589_v55, 2  ;;  %v2232_v10 = vadd.f32 %v584_v37, %v512_v23  ;;  %v2234_v46 = vadd.f32 %v582_v36, %v511_v47  ;;  %v701_v29 = vadd.f32 %v691_v2, %v590_v62 }
 0x187   :  { %v692_v18 = vsel %vm617_vm0, %v690_v41, %v691_v2  ;;  %v1046_v27 = vrot.slane %v590_v62, 6  ;;  %v832_v9 = vrot.slane %v589_v55, 3  ;;  %v903_v4 = vrot.slane %v589_v55, 4 }
 0x188   :  { %v700_v0 = vadd.f32 %v692_v18, %v589_v55  ;;  %v772_v22 = vadd.f32 %v762_v38, %v701_v29  ;;  %v763_v63 = vsel %vm704_vm1, %v761_v53, %v762_v38  ;;  %v974_v8 = vrot.slane %v589_v55, 5 }
 0x189   :  { %v693_v54 = vrot.slane %v2234_v46, 1  ;;  %v834_v15 = vsel %vm775_vm2, %v832_v9, %v833_v56  ;;  %v1045_v23 = vrot.slane %v589_v55, 6  ;;  %v694_v17 = vrot.slane %v2232_v10, 1 }
 0x18a   :  { %v771_v59 = vadd.f32 %v763_v63, %v700_v0  ;;  %v843_v1 = vadd.f32 %v833_v56, %v772_v22  ;;  %v905_v61 = vsel %vm846_vm3, %v903_v4, %v904_v6  ;;  %v976_v47 = vsel %vm917_vm4, %v974_v8, %v975_v44 }
 0x18b   :  { %v764_v48 = vrot.slane %v2234_v46, 2  ;;  %v695_v25 = vsel %vm617_vm0, %v693_v54, %v694_v17  ;;  %v703_v40 = vadd.f32 %v694_v17, %v2232_v10  ;;  %v765_v62 = vrot.slane %v2232_v10, 2 }
 0x18c   :  { %v842_v58 = vadd.f32 %v834_v15, %v771_v59  ;;  %v914_v12 = vadd.f32 %v904_v6, %v843_v1  ;;  %v702_v41 = vadd.f32 %v695_v25, %v2234_v46  ;;  %v835_v55 = vrot.slane %v2234_v46, 3 }
 0x18d   :  { %v836_v2 = vrot.slane %v2232_v10, 3  ;;  %v766_v37 = vsel %vm704_vm1, %v764_v48, %v765_v62  ;;  %v774_v36 = vadd.f32 %v765_v62, %v703_v40  ;;  %v906_v56 = vrot.slane %v2234_v46, 4 }
 0x18e   :  { %v913_v38 = vadd.f32 %v905_v61, %v842_v58  ;;  %v985_v53 = vadd.f32 %v975_v44, %v914_v12  ;;  %v773_v29 = vadd.f32 %v766_v37, %v702_v41  ;;  %v907_v0 = vrot.slane %v2232_v10, 4 }
 0x18f   :  { %v837_v18 = vsel %vm775_vm2, %v835_v55, %v836_v2  ;;  %v845_v6 = vadd.f32 %v836_v2, %v774_v36  ;;  %v977_v4 = vrot.slane %v2234_v46, 5  ;;  %v978_v22 = vrot.slane %v2232_v10, 5 }
 0x190   :  { %v984_v9 = vadd.f32 %v976_v47, %v913_v38  ;;  %v1056_v63 = vadd.f32 %v1046_v27, %v985_v53  ;;  %v1047_v8 = vsel %vm988_vm5, %v1045_v23, %v1046_v27  ;;  %v844_v54 = vadd.f32 %v837_v18, %v773_v29 }
 0x191   :  { %v1029_v59 = vadd.f32 %v1022_v26, %v2218_v28  ;;  %v908_v44 = vsel %vm846_vm3, %v906_v56, %v907_v0  ;;  %v916_v17 = vadd.f32 %v907_v0, %v845_v6  ;;  %v1036_v1 = vsel %vm988_vm5, %v1034_v11, %v1035_v14 }
 0x192   :  { %v1055_v15 = vadd.f32 %v1047_v8, %v984_v9  ;;  %v1076_v61 = vmul.f32 0.020408163, %v1056_v63  ;;  %v915_v47 = vadd.f32 %v908_v44, %v844_v54  ;;  %v979_v48 = vsel %vm917_vm4, %v977_v4, %v978_v22 }
 0x193   :  { %v1043_v58 = vadd.f32 %v1036_v1, %v2224_v57  ;;  %v987_v23 = vadd.f32 %v978_v22, %v916_v17  ;;  %v1048_v28 = vrot.slane %v2234_v46, 6  ;;  %v1049_v26 = vrot.slane %v2232_v10, 6 }
 0x194   :  { %v1075_v27 = vmul.f32 0.020408163, %v1055_v15  ;;  %v1108_v25 = vsub.f32 %v1076_v61, %v1976_v24  ;;  %v986_v40 = vadd.f32 %v979_v48, %v915_v47  ;;  %v1069_v62 = vmul.f32 0.020408163, %v1029_v59 }
 0x195   :  { %v1044_v11 = vadd.f32 %v1035_v14, %v2226_v33  ;;  %v1070_v12 = vmul.f32 0.020408163, %v2229_v20  ;;  %v1050_v2 = vsel %vm988_vm5, %v1048_v28, %v1049_v26  ;;  %v1058_v37 = vadd.f32 %v1049_v26, %v987_v23 }
 0x196   :  { %v1107_v34 = vsub.f32 %v1075_v27, %v1988_v21  ;;  %v1161_v41 = vpop.permute.xlu1 %1160  ;;  %v1112_v57 = vmul.f32 1.0208334, %v1108_v25  ;;  %v1135_v55 = vpop.permute.xlu0 %1134  ;;  %v1085_v46 = vsub.f32 %v1069_v62, %v2185_v39  ;;  %v1057_v33 = vadd.f32 %v1050_v2, %v986_v40 }
 0x197   :  { %v1183_v24 = vadd.f32 %v2115_v16, %v1161_v41  ;;  %v1184_v38 = vadd.f32 %v2102_v43, %v1161_v41  ;;  %v1175_v36 = vadd.f32 %v2086_v42, %v1135_v55  ;;  %v1176_v51 = vadd.f32 %v2000_v3, %v1135_v55 }
 0x198   :  { %v1111_v10 = vmul.f32 1.0208334, %v1107_v34  ;;  %v1146_v21 = vmul.f32 2.0, %v1112_v57  ;;  %v1073_v14 = vmul.f32 0.020408163, %v1043_v58  ;;  %v1086_v53 = vsub.f32 %v1070_v12, %v2143_v13 }
 0x199   :  { %v1074_v56 = vmul.f32 0.020408163, %v1044_v11  ;;  %v1142_v39 = vadd.f32 %v1135_v55, %v2079_v32  ;;  %v1191_v18 = vmul.f32 %v1183_v24, %v1175_v36  ;;  %v1192_v0 = vmul.f32 %v1184_v38, %v1176_v51 }
 0x19a   :  { %v1145_v20 = vmul.f32 2.0, %v1111_v10  ;;  %v1168_v29 = vadd.f32 %v1161_v41, %v1146_v21  ;;  %v1141_v43 = vadd.f32 %v1135_v55, %v2075_v5  ;;  %v1077_v6 = vmul.f32 0.020408163, %v1057_v33  ;;  %v1139_v63 = vpop.permute.xlu1 %1138  ;;  %v1165_v17 = vpop.permute.xlu0 %1164 }
 0x19b   :  { %1256 = vrcp.f32 %v1191_v18  ;;  %v1078_v42 = vmul.f32 0.020408163, %v1058_v37  ;;  %v1097_v3 = vsub.f32 %v1073_v14, %v2189_v60  ;;  %v1098_v22 = vsub.f32 %v1074_v56, %v2149_v30 }
 0x19c   :  { %v1167_v16 = vadd.f32 %v1161_v41, %v1145_v20  ;;  %v1188_v9 = vmul.f32 %v1168_v29, %v1142_v39  ;;  %1258 = vrcp.f32 %v1192_v0  ;;  %v1089_v13 = vmul.f32 1.0208334, %v1085_v46 }
 0x19d   :  { %v1105_v32 = vmul.f32 %v2177_v31, %v2175_v45  ;;  %v1106_v8 = vmul.f32 %v2138_v50, %v2132_v19  ;;  %v1090_v54 = vmul.f32 1.0208334, %v1086_v53  ;;  %v1101_v5 = vmul.f32 1.0208334, %v1097_v3 }
 0x19e   :  { %v1187_v4 = vmul.f32 %v1167_v16, %v1141_v43  ;;  %v1102_v59 = vmul.f32 1.0208334, %v1098_v22  ;;  %v1177_v1 = vadd.f32 %v2201_v49, %v1139_v63  ;;  %v1178_v60 = vadd.f32 %v2160_v52, %v1139_v63 }
 0x19f   :  { %v1109_v15 = vsub.f32 %v1077_v6, %v1105_v32  ;;  %v1110_v44 = vsub.f32 %v1078_v42, %v1106_v8  ;;  %v1181_v61 = vadd.f32 %v1101_v5, %v1089_v13  ;;  %v1143_v28 = vadd.f32 %v1139_v63, %v2197_v35 }
 0x1a0   :  { %v1182_v30 = vadd.f32 %v1102_v59, %v1090_v54  ;;  %v1144_v26 = vadd.f32 %v1139_v63, %v2152_v7 }
 0x1a1   :  { %v1113_v47 = vmul.f32 1.0208334, %v1109_v15  ;;  %v1114_v48 = vmul.f32 1.0208334, %v1110_v44  ;;  %v1185_v58 = vadd.f32 %v1181_v61, %v1165_v17 }
 0x1a2   :  { %v1186_v27 = vadd.f32 %v1182_v30, %v1165_v17 }
 0x1a3   :  { %v1147_v45 = vmul.f32 2.0, %v1113_v47  ;;  %v1148_v31 = vmul.f32 2.0, %v1114_v48  ;;  %v1193_v23 = vmul.f32 %v1185_v58, %v1177_v1 }
 0x1a4   :  { %v1194_v19 = vmul.f32 %v1186_v27, %v1178_v60 }
 0x1a5   :  { %v1257_v50 = vpop.eup %1256  ;;  %v1169_v25 = vadd.f32 %v1165_v17, %v1147_v45  ;;  %v1170_v49 = vadd.f32 %v1165_v17, %v1148_v31  ;;  %1260 = vrcp.f32 %v1193_v23 }
 0x1a6   :  { %v1259_v40 = vpop.eup %1258  ;;  %v1196_v52 = vmul.f32 %v1257_v50, %v1187_v4  ;;  %1262 = vrcp.f32 %v1194_v19 }
 0x1a7   :  { %v1189_v62 = vmul.f32 %v1169_v25, %v1143_v28  ;;  %v1190_v34 = vmul.f32 %v1170_v49, %v1144_v26  ;;  %v1198_v11 = vmul.f32 %v1259_v40, %v1188_v9 }
 0x1a8   :  { %v1204_v12 = vsel %vm1203_vm6, %v1196_v52, 0.0 }
 0x1a9   :  { %v1206_v41 = vsel %vm1205_vm7, %v1198_v11, 0.0 }
 0x1aa   :  { %v1207_v57 = vadd.f32 %v1206_v41, %v1204_v12 }
 0x1af   :  { %v1261_v55 = vpop.eup %1260 }
 0x1b0   :  { %v1263_v2 = vpop.eup %1262  ;;  %v1200_v46 = vmul.f32 %v1261_v55, %v1189_v62 }
 0x1b1   :  { %v1202_v35 = vmul.f32 %v1263_v2, %v1190_v34 }
 0x1b2   :  { %v1208_v7 = vsel %vm1203_vm6, %v1200_v46, 0.0 }
 0x1b3   :  { %v1209_v10 = vadd.f32 %v1208_v7, %v1207_v57  ;;  %v1210_v24 = vsel %vm1205_vm7, %v1202_v35, 0.0 }
 0x1b5   :  { %v1211_v38 = vadd.f32 %v1210_v24, %v1209_v10 }
 0x1b7   :  { %1212 = vadd.xlane.f32.xlu1 %v1211_v38 }
 0x244   :  { %v1213_v37 = vpop.xlane.xlu1 %1212 }
 0x245   :  { %v1214_v21 = vrot.slane %v1213_v37, 4 }
 0x247   :  { %v1215_v36 = vadd.f32 %v1214_v21, %v1213_v37 }
 0x249   :  { %v1216_v51 = vrot.slane %v1215_v36, 2 }
 0x24b   :  { %v1217_v33 = vadd.f32 %v1216_v51, %v1215_v36 }
 0x24d   :  { %v1218_v20 = vrot.slane %v1217_v33, 1 }
 0x24f   :  { %v1219_v14 = vadd.f32 %v1218_v20, %v1217_v33 }
 0x251   :  { %1240 = vpush %v1219_v14 }
 0x282   :  { %s1241_s20 = spop %1240 }
 0x283   :  { %v1221_v56 = vstv %s1241_s20 }
 0x284   :  { %1223 = vst [vmem:[#allocation7] sm:$0xff] %v1221_v56 }
 0x285   :  { %1319 = shalt.err (!%p1316_p6)
}
 0x286   :  { %s1320_s24 = scalar_lea.hbm %s2310_s3, 128 }
 0x287   :  { %p1321_p7 = scmp.ne.s32.totalorder %s2310_s3, %s1320_s24  ;;  %p1324_p8 = scmp.lt.u32.totalorder %s1320_s24, %s2310_s3 }
 0x289   :  { %p1326_p9 = pnand %p1324_p8, %p1321_p7 }
 0x28b   :  { %1329 = shalt.err (!%p1326_p9)
}
 0x28c   :  { %1233 = dma.vmem_to_hbm [thread:$0]  %s1231_s19, 128, %s2310_s3, [#allocation4]  }
 0x28d   :  { %1334 = dma.done.wait [#allocation4], 128  }
 0x28e   :  { %1335 = vsyncadd [#allocation4], 4294967168 }
 0x28f   :  { %1237 = vsyncpa [#allocation3], 1 }
 0x290   :  { %1238 = vsyncpa [#allocation6], 1 }
 0x291   :  { %1239 = vsyncpa [#allocation4], 1 }

</bundles_post_ra>
